<compile_context>
chip_gen: v7x
topology: tpu7x:2x2x1
jax: 0.10.0
libtpu: 0.0.40
codegen_flags: <defaults>
</compile_context>

<pallas_src>
import functools

import jax
import jax.numpy as jnp
from jax import lax
from jax.experimental import pallas as pl
from jax.experimental.pallas import tpu as pltpu


GATE_PAD = 128  # lane-aligned width of each gate group (r | z | n)


def _ceil_to(x, m):
    return max(m, ((x + m - 1) // m) * m)


# ---------------------------------------------------------------------------
# Kernel
# ---------------------------------------------------------------------------
def _bigru_ln_kernel(x_ref, w_in_ref, b_in_ref, w_rec_ref, b_rec_ref,
                     gamma_ref, beta_ref, out_ref, gi_ref, *,
                     T, B_pad, H, GP, hid):
    # ---- Input projection: ONE matmul for every timestep and both directions.
    # Row block s holds, for x[s]: forward gate inputs in lanes [c, c+H) and
    # reverse-direction gate inputs in lanes [c+H, c+2H) of each gate group c.
    # Input biases are folded in. Result parked in VMEM scratch so the loop's
    # working set is one step.
    gi_ref[...] = jnp.dot(x_ref[...], w_in_ref[...],
                          preferred_element_type=jnp.float32) + b_in_ref[...]

    # Loop-invariant recurrent weights/bias (read once; stays resident).
    w_rec = w_rec_ref[...]            # (GP, 3*GP) bf16, block-diag per dir
    b_rec = b_rec_ref[...]            # (1, 3*GP)  f32, only n-gate hidden bias

    # Hoisted lane masks (GP is a power of two).
    lane3 = lax.broadcasted_iota(jnp.int32, (1, 3 * GP), 1)
    is_fwd = (lane3 & (GP - 1)) < H            # fwd lanes of each gate group
    lane1 = lax.broadcasted_iota(jnp.int32, (1, GP), 1)
    out_mask = (lane1 < hid).astype(jnp.float32)

    def step(t, h):
        # Recurrent matmul: the only MXU+EUP work on the serial chain.
        gh = jnp.dot(h.astype(jnp.bfloat16), w_rec,
                     preferred_element_type=jnp.float32) + b_rec
        # Forward direction reads row block t, reverse reads row block T-1-t;
        # both slices are sublane(8)-aligned, the blend is one vselect.
        off_f = pl.multiple_of(t * B_pad, B_pad)
        off_r = pl.multiple_of((T - 1 - t) * B_pad, B_pad)
        gi = jnp.where(is_fwd,
                       gi_ref[pl.ds(off_f, B_pad), :],
                       gi_ref[pl.ds(off_r, B_pad), :])
        # All gate slices sit on 128-lane boundaries (pure VPU, no XLU).
        rz = jax.nn.sigmoid(gi[:, :2 * GP] + gh[:, :2 * GP])
        r = rz[:, :GP]
        z = rz[:, GP:]
        n = jnp.tanh(gi[:, 2 * GP:] + r * gh[:, 2 * GP:])
        # Pad lanes: gi=gh=0 -> z=0.5, n=0 -> h stays exactly 0.
        return (1.0 - z) * n + z * h

    h0 = jnp.zeros((B_pad, GP), jnp.float32)   # fwd lanes [0,H), bwd [H,2H)
    h = lax.fori_loop(0, T, step, h0, unroll=True)

    # LayerNorm over the first `hid` lanes. Pad lanes of h are exactly 0, so
    # the full-width sum equals the sum over the valid lanes.
    inv_hid = 1.0 / hid
    mean = jnp.sum(h, axis=-1, keepdims=True) * inv_hid
    hc = (h - mean) * out_mask
    var = jnp.sum(hc * hc, axis=-1, keepdims=True) * inv_hid
    # gamma/beta are zero-padded to GP lanes -> pad lanes of the output are 0;
    # store is a full lane-dense (B_pad, 128) block (no masked vst).
    out_ref[...] = hc * lax.rsqrt(var + 1e-5) * gamma_ref[...] + beta_ref[...]


# ---------------------------------------------------------------------------
# One-time parameter packing (run ONCE per parameter set, cached by caller).
# ---------------------------------------------------------------------------
def pack_params(params, gate_pad=GATE_PAD):
    """Pack PyTorch-layout GRU/LayerNorm params into the fused/padded layout."""
    H = params["whh_f"].shape[1]
    D = params["wih_f"].shape[1]
    hid = 2 * H
    GP = gate_pad
    assert 2 * H <= GP, "hidden width (both directions) must fit one gate group"
    D_pad = _ceil_to(D, 8)
    f32, bf16 = jnp.float32, jnp.bfloat16

    def gate_t(w, g):                      # (3H, in) -> (in, H) gate block
        return w[g * H:(g + 1) * H, :].T.astype(f32)

    # Pad lanes/rows are built exactly zero; the kernel's "pad lanes of h stay
    # 0" invariant depends on it (do not quantize/perturb these arrays later).
    w_in = jnp.zeros((D_pad, 3 * GP), f32)     # fwd lanes | bwd lanes | 0-pad
    w_rec = jnp.zeros((GP, 3 * GP), f32)       # block-diagonal per direction
    b_in = jnp.zeros((3 * GP,), f32)
    b_rec = jnp.zeros((3 * GP,), f32)

    for g in range(3):                         # gate order [r, z, n]
        c = g * GP
        w_in = w_in.at[:D, c:c + H].set(gate_t(params["wih_f"], g))
        w_in = w_in.at[:D, c + H:c + 2 * H].set(gate_t(params["wih_r"], g))
        w_rec = w_rec.at[:H, c:c + H].set(gate_t(params["whh_f"], g))
        w_rec = w_rec.at[H:2 * H, c + H:c + 2 * H].set(gate_t(params["whh_r"], g))

        bif = params["bih_f"][g * H:(g + 1) * H]
        bir = params["bih_r"][g * H:(g + 1) * H]
        bhf = params["bhh_f"][g * H:(g + 1) * H]
        bhr = params["bhh_r"][g * H:(g + 1) * H]
        if g < 2:
            # r, z: input + hidden biases pre-combined on the input side.
            b_in = b_in.at[c:c + H].set(bif + bhf)
            b_in = b_in.at[c + H:c + 2 * H].set(bir + bhr)
        else:
            # n: PyTorch keeps them apart: n = tanh(i_n+b_in + r*(h_n+b_hn)).
            b_in = b_in.at[c:c + H].set(bif)
            b_in = b_in.at[c + H:c + 2 * H].set(bir)
            b_rec = b_rec.at[c:c + H].set(bhf)
            b_rec = b_rec.at[c + H:c + 2 * H].set(bhr)

    gamma = jnp.zeros((GP,), f32).at[:hid].set(params["gamma"].astype(f32))
    beta = jnp.zeros((GP,), f32).at[:hid].set(params["beta"].astype(f32))

    packed = {
        "w_in": w_in.astype(bf16),             # (D_pad, 3*GP)
        "b_in": b_in.reshape(1, 3 * GP),       # f32
        "w_rec": w_rec.astype(bf16),           # (GP, 3*GP)
        "b_rec": b_rec.reshape(1, 3 * GP),     # f32
        "gamma": gamma.reshape(1, GP),
        "beta": beta.reshape(1, GP),
    }
    return jax.tree_util.tree_map(jax.block_until_ready, packed)


# ---------------------------------------------------------------------------
# Per-call wrapper: only x layout work + pallas_call.
# ---------------------------------------------------------------------------
@functools.partial(jax.jit, static_argnames=("hid",))
def time_series_encoder(x, packed, *, hid):
    """x: (B, T, D) float32, packed: output of pack_params -> (B, hid) f32."""
    B, T, D = x.shape
    H = hid // 2
    GP = packed["w_rec"].shape[0]
    D_pad = packed["w_in"].shape[0]
    B_pad = _ceil_to(B, 8)

    # Time-major, batch padded to 8 sublanes, feature padded to match w_in.
    x_tm = jnp.transpose(x, (1, 0, 2))                              # (T, B, D)
    x_tm = jnp.pad(x_tm, ((0, 0), (0, B_pad - B), (0, D_pad - D)))
    x_flat = x_tm.reshape(T * B_pad, D_pad).astype(jnp.bfloat16)

    kernel = functools.partial(_bigru_ln_kernel, T=T, B_pad=B_pad, H=H,
                               GP=GP, hid=hid)
    vmem = pl.BlockSpec(memory_space=pltpu.MemorySpace.VMEM)
    out = pl.pallas_call(
        kernel,
        out_shape=jax.ShapeDtypeStruct((B_pad, GP), jnp.float32),
        in_specs=[vmem] * 7,
        out_specs=vmem,
        scratch_shapes=[pltpu.VMEM((T * B_pad, 3 * GP), jnp.float32)],
    )(x_flat, packed["w_in"], packed["b_in"], packed["w_rec"],
      packed["b_rec"], packed["gamma"], packed["beta"])

    return out[:B, :hid]


# ---------------------------------------------------------------------------
# Synthetic init (nn.GRU / nn.LayerNorm shapes) + reference
# ---------------------------------------------------------------------------
def init_params(key, in_dim, hid):
    H = hid // 2
    k = 1.0 / jnp.sqrt(jnp.float32(H))
    keys = jax.random.split(key, 8)

    def u(kk, shape):
        return jax.random.uniform(kk, shape, jnp.float32, minval=-k, maxval=k)

    return {
        # forward direction (l0)
        "wih_f": u(keys[0], (3 * H, in_dim)),
        "whh_f": u(keys[1], (3 * H, H)),
        "bih_f": u(keys[2], (3 * H,)),
        "bhh_f": u(keys[3], (3 * H,)),
        # reverse direction (l0_reverse)
        "wih_r": u(keys[4], (3 * H, in_dim)),
        "whh_r": u(keys[5], (3 * H, H)),
        "bih_r": u(keys[6], (3 * H,)),
        "bhh_r": u(keys[7], (3 * H,)),
        # LayerNorm
        "gamma": jnp.ones((hid,), jnp.float32),
        "beta": jnp.zeros((hid,), jnp.float32),
    }


def _reference(x, params, matmul_dtype=jnp.bfloat16):
    """Pure-JAX reference of the same forward pass.

    Matmul inputs are cast to `matmul_dtype` exactly like the kernel (bf16 MXU
    inputs, f32 accumulation / state / LayerNorm). Pass matmul_dtype=f32 for
    the full-f32 math.
    """
    B, T, D = x.shape
    H = params["whh_f"].shape[1]
    md = matmul_dtype

    def mm(a, b):
        return jnp.dot(a.astype(md), b.astype(md),
                       preferred_element_type=jnp.float32)

    def step(h, x_t, wih, whh, bih, bhh):
        gi = mm(x_t, wih.T) + bih
        gh = mm(h, whh.T) + bhh
        i_r, i_z, i_n = gi[:, :H], gi[:, H:2 * H], gi[:, 2 * H:]
        h_r, h_z, h_n = gh[:, :H], gh[:, H:2 * H], gh[:, 2 * H:]
        r = jax.nn.sigmoid(i_r + h_r)
        z = jax.nn.sigmoid(i_z + h_z)
        n = jnp.tanh(i_n + r * h_n)
        return (1.0 - z) * n + z * h

    hf = jnp.zeros((B, H), jnp.float32)
    hb = jnp.zeros((B, H), jnp.float32)
    for t in range(T):
        hf = step(hf, x[:, t, :], params["wih_f"], params["whh_f"],
                  params["bih_f"], params["bhh_f"])
        hb = step(hb, x[:, T - 1 - t, :], params["wih_r"], params["whh_r"],
                  params["bih_r"], params["bhh_r"])
    h = jnp.concatenate([hf, hb], axis=-1)
    mean = jnp.mean(h, -1, keepdims=True)
    var = jnp.mean((h - mean) ** 2, -1, keepdims=True)
    return (h - mean) * lax.rsqrt(var + 1e-5) * params["gamma"] + params["beta"]


if __name__ == "__main__":
    B, T, D, HID = 2, 8, 4, 32

    key = jax.random.PRNGKey(0)
    k_x, k_p = jax.random.split(key)
    x = jax.random.normal(k_x, (B, T, D), jnp.float32)
    params = init_params(k_p, D, HID)

    packed = pack_params(params)               # one-time packing, reused
    out = jax.block_until_ready(time_series_encoder(x, packed, hid=HID))
    ref = jax.block_until_ready(_reference(x, params))   # bf16-matched ref

    assert out.shape == (B, HID), out.shape
    assert jnp.allclose(out, ref, atol=2e-3, rtol=2e-3), float(
        jnp.max(jnp.abs(out - ref)))
    print("KERNEL_OK")
</pallas_src>

<mosaic_0001>
module attributes {stable_mosaic.version = 11 : i64} {
  func.func @_bigru_ln_kernel(%arg0: memref<64x8xbf16, #tpu.memory_space<vmem>>, %arg1: memref<8x384xbf16, #tpu.memory_space<vmem>>, %arg2: memref<1x384xf32, #tpu.memory_space<vmem>>, %arg3: memref<128x384xbf16, #tpu.memory_space<vmem>>, %arg4: memref<1x384xf32, #tpu.memory_space<vmem>>, %arg5: memref<1x128xf32, #tpu.memory_space<vmem>>, %arg6: memref<1x128xf32, #tpu.memory_space<vmem>>, %arg7: memref<8x128xf32, #tpu.memory_space<vmem>>, %arg8: memref<64x384xf32, #tpu.memory_space<vmem>>) attributes {dimension_semantics = [], scalar_prefetch = 0 : i64, scratch_operands = 1 : i64, tpu.core_type = #tpu.core_type<tc>} {
    %c0 = arith.constant 0 : index
    %c0_0 = arith.constant 0 : index
    %0 = vector.load %arg0[%c0, %c0_0] : memref<64x8xbf16, #tpu.memory_space<vmem>>, vector<64x8xbf16>
    %c0_1 = arith.constant 0 : index
    %c0_2 = arith.constant 0 : index
    %1 = vector.load %arg1[%c0_1, %c0_2] : memref<8x384xbf16, #tpu.memory_space<vmem>>, vector<8x384xbf16>
    %cst = arith.constant dense<0.000000e+00> : vector<64x384xf32>
    %2 = tpu.matmul %0, %1, %cst {dimension_numbers = #tpu.dot_dimension_numbers<[1], [0], [0], [1], [0, 0, 1, 1], [], []>} : vector<64x8xbf16>, vector<8x384xbf16>, vector<64x384xf32> -> vector<64x384xf32>
    %c0_3 = arith.constant 0 : index
    %c0_4 = arith.constant 0 : index
    %3 = vector.load %arg2[%c0_3, %c0_4] : memref<1x384xf32, #tpu.memory_space<vmem>>, vector<1x384xf32>
    %4 = vector.broadcast %3 : vector<1x384xf32> to vector<64x384xf32>
    %5 = arith.addf %2, %4 : vector<64x384xf32>
    %c0_5 = arith.constant 0 : index
    %c0_6 = arith.constant 0 : index
    %6 = vector.load %arg8[%c0_5, %c0_6] : memref<64x384xf32, #tpu.memory_space<vmem>>, vector<64x384xf32>
    tpu.vector_store %arg8[%c0_5, %c0_6], %5 {strides = array<i32>} : memref<64x384xf32, #tpu.memory_space<vmem>>, vector<64x384xf32>,
    %c0_7 = arith.constant 0 : index
    %c0_8 = arith.constant 0 : index
    %7 = vector.load %arg3[%c0_7, %c0_8] : memref<128x384xbf16, #tpu.memory_space<vmem>>, vector<128x384xbf16>
    %c0_9 = arith.constant 0 : index
    %c0_10 = arith.constant 0 : index
    %8 = vector.load %arg4[%c0_9, %c0_10] : memref<1x384xf32, #tpu.memory_space<vmem>>, vector<1x384xf32>
    %9 = tpu.iota {dimensions = array<i32: 1>} : vector<1x384xi32>
    %c127_i32 = arith.constant 127 : i32
    %10 = vector.broadcast %c127_i32 : i32 to vector<1x384xi32>
    %11 = arith.andi %9, %10 : vector<1x384xi32>
    %c16_i32 = arith.constant 16 : i32
    %12 = vector.broadcast %c16_i32 : i32 to vector<1x384xi32>
    %13 = arith.cmpi slt, %11, %12 : vector<1x384xi32>
    %14 = tpu.iota {dimensions = array<i32: 1>} : vector<1x128xi32>
    %c32_i32 = arith.constant 32 : i32
    %15 = vector.broadcast %c32_i32 : i32 to vector<1x128xi32>
    %16 = arith.cmpi slt, %14, %15 : vector<1x128xi32>
    %17 = arith.extui %16 : vector<1x128xi1> to vector<1x128xi32>
    %18 = arith.sitofp %17 : vector<1x128xi32> to vector<1x128xf32>
    %cst_11 = arith.constant 0.000000e+00 : f32
    %19 = vector.broadcast %cst_11 : f32 to vector<8x128xf32>
    %c0_i32 = arith.constant 0 : i32
    %20 = arith.truncf %19 : vector<8x128xf32> to vector<8x128xbf16>
    %cst_12 = arith.constant dense<0.000000e+00> : vector<8x384xf32>
    %21 = tpu.matmul %20, %7, %cst_12 {dimension_numbers = #tpu.dot_dimension_numbers<[1], [0], [0], [1], [0, 0, 1, 1], [], []>} : vector<8x128xbf16>, vector<128x384xbf16>, vector<8x384xf32> -> vector<8x384xf32>
    %22 = vector.broadcast %8 : vector<1x384xf32> to vector<8x384xf32>
    %23 = arith.addf %21, %22 : vector<8x384xf32>
    %c8_i32 = arith.constant 8 : i32
    %24 = arith.muli %c0_i32, %c8_i32 : i32
    %25 = tpu.assume_multiple %24, 8 : i32
    %c7_i32 = arith.constant 7 : i32
    %26 = arith.subi %c7_i32, %c0_i32 : i32
    %c8_i32_13 = arith.constant 8 : i32
    %27 = arith.muli %26, %c8_i32_13 : i32
    %28 = tpu.assume_multiple %27, 8 : i32
    %29 = arith.index_cast %25 : i32 to index
    %c0_14 = arith.constant 0 : index
    %30 = vector.load %arg8[%29, %c0_14] : memref<64x384xf32, #tpu.memory_space<vmem>>, vector<8x384xf32>
    %31 = arith.index_cast %28 : i32 to index
    %c0_15 = arith.constant 0 : index
    %32 = vector.load %arg8[%31, %c0_15] : memref<64x384xf32, #tpu.memory_space<vmem>>, vector<8x384xf32>
    %33 = vector.shape_cast %13 : vector<1x384xi1> to vector<1x384xi1>
    %34 = vector.broadcast %33 : vector<1x384xi1> to vector<8x384xi1>
    %35 = arith.select %34, %30, %32 : vector<8x384xi1>, vector<8x384xf32>
    %36 = vector.extract_strided_slice %35 {offsets = [0, 0], sizes = [8, 256], strides = [1, 1]} : vector<8x384xf32> to vector<8x256xf32>
    %37 = vector.extract_strided_slice %23 {offsets = [0, 0], sizes = [8, 256], strides = [1, 1]} : vector<8x384xf32> to vector<8x256xf32>
    %38 = arith.addf %36, %37 : vector<8x256xf32>
    %39 = arith.negf %38 : vector<8x256xf32>
    %40 = math.exp %39 : vector<8x256xf32>
    %cst_16 = arith.constant 1.000000e+00 : f32
    %41 = vector.broadcast %cst_16 : f32 to vector<8x256xf32>
    %42 = arith.addf %41, %40 : vector<8x256xf32>
    %43 = arith.divf %41, %42 : vector<8x256xf32>
    %44 = vector.extract_strided_slice %43 {offsets = [0, 0], sizes = [8, 128], strides = [1, 1]} : vector<8x256xf32> to vector<8x128xf32>
    %45 = vector.extract_strided_slice %43 {offsets = [0, 128], sizes = [8, 128], strides = [1, 1]} : vector<8x256xf32> to vector<8x128xf32>
    %46 = vector.extract_strided_slice %35 {offsets = [0, 256], sizes = [8, 128], strides = [1, 1]} : vector<8x384xf32> to vector<8x128xf32>
    %47 = vector.extract_strided_slice %23 {offsets = [0, 256], sizes = [8, 128], strides = [1, 1]} : vector<8x384xf32> to vector<8x128xf32>
    %48 = arith.mulf %44, %47 : vector<8x128xf32>
    %49 = arith.addf %46, %48 : vector<8x128xf32>
    %50 = math.tanh %49 : vector<8x128xf32>
    %cst_17 = arith.constant 1.000000e+00 : f32
    %51 = vector.broadcast %cst_17 : f32 to vector<8x128xf32>
    %52 = arith.subf %51, %45 : vector<8x128xf32>
    %53 = arith.mulf %52, %50 : vector<8x128xf32>
    %54 = arith.mulf %45, %19 : vector<8x128xf32>
    %55 = arith.addf %53, %54 : vector<8x128xf32>
    %c1_i32 = arith.constant 1 : i32
    %56 = arith.truncf %55 : vector<8x128xf32> to vector<8x128xbf16>
    %cst_18 = arith.constant dense<0.000000e+00> : vector<8x384xf32>
    %57 = tpu.matmul %56, %7, %cst_18 {dimension_numbers = #tpu.dot_dimension_numbers<[1], [0], [0], [1], [0, 0, 1, 1], [], []>} : vector<8x128xbf16>, vector<128x384xbf16>, vector<8x384xf32> -> vector<8x384xf32>
    %58 = vector.broadcast %8 : vector<1x384xf32> to vector<8x384xf32>
    %59 = arith.addf %57, %58 : vector<8x384xf32>
    %c8_i32_19 = arith.constant 8 : i32
    %60 = arith.muli %c1_i32, %c8_i32_19 : i32
    %61 = tpu.assume_multiple %60, 8 : i32
    %c7_i32_20 = arith.constant 7 : i32
    %62 = arith.subi %c7_i32_20, %c1_i32 : i32
    %c8_i32_21 = arith.constant 8 : i32
    %63 = arith.muli %62, %c8_i32_21 : i32
    %64 = tpu.assume_multiple %63, 8 : i32
    %65 = arith.index_cast %61 : i32 to index
    %c0_22 = arith.constant 0 : index
    %66 = vector.load %arg8[%65, %c0_22] : memref<64x384xf32, #tpu.memory_space<vmem>>, vector<8x384xf32>
    %67 = arith.index_cast %64 : i32 to index
    %c0_23 = arith.constant 0 : index
    %68 = vector.load %arg8[%67, %c0_23] : memref<64x384xf32, #tpu.memory_space<vmem>>, vector<8x384xf32>
    %69 = vector.shape_cast %13 : vector<1x384xi1> to vector<1x384xi1>
    %70 = vector.broadcast %69 : vector<1x384xi1> to vector<8x384xi1>
    %71 = arith.select %70, %66, %68 : vector<8x384xi1>, vector<8x384xf32>
    %72 = vector.extract_strided_slice %71 {offsets = [0, 0], sizes = [8, 256], strides = [1, 1]} : vector<8x384xf32> to vector<8x256xf32>
    %73 = vector.extract_strided_slice %59 {offsets = [0, 0], sizes = [8, 256], strides = [1, 1]} : vector<8x384xf32> to vector<8x256xf32>
    %74 = arith.addf %72, %73 : vector<8x256xf32>
    %75 = arith.negf %74 : vector<8x256xf32>
    %76 = math.exp %75 : vector<8x256xf32>
    %cst_24 = arith.constant 1.000000e+00 : f32
    %77 = vector.broadcast %cst_24 : f32 to vector<8x256xf32>
    %78 = arith.addf %77, %76 : vector<8x256xf32>
    %79 = arith.divf %77, %78 : vector<8x256xf32>
    %80 = vector.extract_strided_slice %79 {offsets = [0, 0], sizes = [8, 128], strides = [1, 1]} : vector<8x256xf32> to vector<8x128xf32>
    %81 = vector.extract_strided_slice %79 {offsets = [0, 128], sizes = [8, 128], strides = [1, 1]} : vector<8x256xf32> to vector<8x128xf32>
    %82 = vector.extract_strided_slice %71 {offsets = [0, 256], sizes = [8, 128], strides = [1, 1]} : vector<8x384xf32> to vector<8x128xf32>
    %83 = vector.extract_strided_slice %59 {offsets = [0, 256], sizes = [8, 128], strides = [1, 1]} : vector<8x384xf32> to vector<8x128xf32>
    %84 = arith.mulf %80, %83 : vector<8x128xf32>
    %85 = arith.addf %82, %84 : vector<8x128xf32>
    %86 = math.tanh %85 : vector<8x128xf32>
    %cst_25 = arith.constant 1.000000e+00 : f32
    %87 = vector.broadcast %cst_25 : f32 to vector<8x128xf32>
    %88 = arith.subf %87, %81 : vector<8x128xf32>
    %89 = arith.mulf %88, %86 : vector<8x128xf32>
    %90 = arith.mulf %81, %55 : vector<8x128xf32>
    %91 = arith.addf %89, %90 : vector<8x128xf32>
    %c2_i32 = arith.constant 2 : i32
    %92 = arith.truncf %91 : vector<8x128xf32> to vector<8x128xbf16>
    %cst_26 = arith.constant dense<0.000000e+00> : vector<8x384xf32>
    %93 = tpu.matmul %92, %7, %cst_26 {dimension_numbers = #tpu.dot_dimension_numbers<[1], [0], [0], [1], [0, 0, 1, 1], [], []>} : vector<8x128xbf16>, vector<128x384xbf16>, vector<8x384xf32> -> vector<8x384xf32>
    %94 = vector.broadcast %8 : vector<1x384xf32> to vector<8x384xf32>
    %95 = arith.addf %93, %94 : vector<8x384xf32>
    %c8_i32_27 = arith.constant 8 : i32
    %96 = arith.muli %c2_i32, %c8_i32_27 : i32
    %97 = tpu.assume_multiple %96, 8 : i32
    %c7_i32_28 = arith.constant 7 : i32
    %98 = arith.subi %c7_i32_28, %c2_i32 : i32
    %c8_i32_29 = arith.constant 8 : i32
    %99 = arith.muli %98, %c8_i32_29 : i32
    %100 = tpu.assume_multiple %99, 8 : i32
    %101 = arith.index_cast %97 : i32 to index
    %c0_30 = arith.constant 0 : index
    %102 = vector.load %arg8[%101, %c0_30] : memref<64x384xf32, #tpu.memory_space<vmem>>, vector<8x384xf32>
    %103 = arith.index_cast %100 : i32 to index
    %c0_31 = arith.constant 0 : index
    %104 = vector.load %arg8[%103, %c0_31] : memref<64x384xf32, #tpu.memory_space<vmem>>, vector<8x384xf32>
    %105 = vector.shape_cast %13 : vector<1x384xi1> to vector<1x384xi1>
    %106 = vector.broadcast %105 : vector<1x384xi1> to vector<8x384xi1>
    %107 = arith.select %106, %102, %104 : vector<8x384xi1>, vector<8x384xf32>
    %108 = vector.extract_strided_slice %107 {offsets = [0, 0], sizes = [8, 256], strides = [1, 1]} : vector<8x384xf32> to vector<8x256xf32>
    %109 = vector.extract_strided_slice %95 {offsets = [0, 0], sizes = [8, 256], strides = [1, 1]} : vector<8x384xf32> to vector<8x256xf32>
    %110 = arith.addf %108, %109 : vector<8x256xf32>
    %111 = arith.negf %110 : vector<8x256xf32>
    %112 = math.exp %111 : vector<8x256xf32>
    %cst_32 = arith.constant 1.000000e+00 : f32
    %113 = vector.broadcast %cst_32 : f32 to vector<8x256xf32>
    %114 = arith.addf %113, %112 : vector<8x256xf32>
    %115 = arith.divf %113, %114 : vector<8x256xf32>
    %116 = vector.extract_strided_slice %115 {offsets = [0, 0], sizes = [8, 128], strides = [1, 1]} : vector<8x256xf32> to vector<8x128xf32>
    %117 = vector.extract_strided_slice %115 {offsets = [0, 128], sizes = [8, 128], strides = [1, 1]} : vector<8x256xf32> to vector<8x128xf32>
    %118 = vector.extract_strided_slice %107 {offsets = [0, 256], sizes = [8, 128], strides = [1, 1]} : vector<8x384xf32> to vector<8x128xf32>
    %119 = vector.extract_strided_slice %95 {offsets = [0, 256], sizes = [8, 128], strides = [1, 1]} : vector<8x384xf32> to vector<8x128xf32>
    %120 = arith.mulf %116, %119 : vector<8x128xf32>
    %121 = arith.addf %118, %120 : vector<8x128xf32>
    %122 = math.tanh %121 : vector<8x128xf32>
    %cst_33 = arith.constant 1.000000e+00 : f32
    %123 = vector.broadcast %cst_33 : f32 to vector<8x128xf32>
    %124 = arith.subf %123, %117 : vector<8x128xf32>
    %125 = arith.mulf %124, %122 : vector<8x128xf32>
    %126 = arith.mulf %117, %91 : vector<8x128xf32>
    %127 = arith.addf %125, %126 : vector<8x128xf32>
    %c3_i32 = arith.constant 3 : i32
    %128 = arith.truncf %127 : vector<8x128xf32> to vector<8x128xbf16>
    %cst_34 = arith.constant dense<0.000000e+00> : vector<8x384xf32>
    %129 = tpu.matmul %128, %7, %cst_34 {dimension_numbers = #tpu.dot_dimension_numbers<[1], [0], [0], [1], [0, 0, 1, 1], [], []>} : vector<8x128xbf16>, vector<128x384xbf16>, vector<8x384xf32> -> vector<8x384xf32>
    %130 = vector.broadcast %8 : vector<1x384xf32> to vector<8x384xf32>
    %131 = arith.addf %129, %130 : vector<8x384xf32>
    %c8_i32_35 = arith.constant 8 : i32
    %132 = arith.muli %c3_i32, %c8_i32_35 : i32
    %133 = tpu.assume_multiple %132, 8 : i32
    %c7_i32_36 = arith.constant 7 : i32
    %134 = arith.subi %c7_i32_36, %c3_i32 : i32
    %c8_i32_37 = arith.constant 8 : i32
    %135 = arith.muli %134, %c8_i32_37 : i32
    %136 = tpu.assume_multiple %135, 8 : i32
    %137 = arith.index_cast %133 : i32 to index
    %c0_38 = arith.constant 0 : index
    %138 = vector.load %arg8[%137, %c0_38] : memref<64x384xf32, #tpu.memory_space<vmem>>, vector<8x384xf32>
    %139 = arith.index_cast %136 : i32 to index
    %c0_39 = arith.constant 0 : index
    %140 = vector.load %arg8[%139, %c0_39] : memref<64x384xf32, #tpu.memory_space<vmem>>, vector<8x384xf32>
    %141 = vector.shape_cast %13 : vector<1x384xi1> to vector<1x384xi1>
    %142 = vector.broadcast %141 : vector<1x384xi1> to vector<8x384xi1>
    %143 = arith.select %142, %138, %140 : vector<8x384xi1>, vector<8x384xf32>
    %144 = vector.extract_strided_slice %143 {offsets = [0, 0], sizes = [8, 256], strides = [1, 1]} : vector<8x384xf32> to vector<8x256xf32>
    %145 = vector.extract_strided_slice %131 {offsets = [0, 0], sizes = [8, 256], strides = [1, 1]} : vector<8x384xf32> to vector<8x256xf32>
    %146 = arith.addf %144, %145 : vector<8x256xf32>
    %147 = arith.negf %146 : vector<8x256xf32>
    %148 = math.exp %147 : vector<8x256xf32>
    %cst_40 = arith.constant 1.000000e+00 : f32
    %149 = vector.broadcast %cst_40 : f32 to vector<8x256xf32>
    %150 = arith.addf %149, %148 : vector<8x256xf32>
    %151 = arith.divf %149, %150 : vector<8x256xf32>
    %152 = vector.extract_strided_slice %151 {offsets = [0, 0], sizes = [8, 128], strides = [1, 1]} : vector<8x256xf32> to vector<8x128xf32>
    %153 = vector.extract_strided_slice %151 {offsets = [0, 128], sizes = [8, 128], strides = [1, 1]} : vector<8x256xf32> to vector<8x128xf32>
    %154 = vector.extract_strided_slice %143 {offsets = [0, 256], sizes = [8, 128], strides = [1, 1]} : vector<8x384xf32> to vector<8x128xf32>
    %155 = vector.extract_strided_slice %131 {offsets = [0, 256], sizes = [8, 128], strides = [1, 1]} : vector<8x384xf32> to vector<8x128xf32>
    %156 = arith.mulf %152, %155 : vector<8x128xf32>
    %157 = arith.addf %154, %156 : vector<8x128xf32>
    %158 = math.tanh %157 : vector<8x128xf32>
    %cst_41 = arith.constant 1.000000e+00 : f32
    %159 = vector.broadcast %cst_41 : f32 to vector<8x128xf32>
    %160 = arith.subf %159, %153 : vector<8x128xf32>
    %161 = arith.mulf %160, %158 : vector<8x128xf32>
    %162 = arith.mulf %153, %127 : vector<8x128xf32>
    %163 = arith.addf %161, %162 : vector<8x128xf32>
    %c4_i32 = arith.constant 4 : i32
    %164 = arith.truncf %163 : vector<8x128xf32> to vector<8x128xbf16>
    %cst_42 = arith.constant dense<0.000000e+00> : vector<8x384xf32>
    %165 = tpu.matmul %164, %7, %cst_42 {dimension_numbers = #tpu.dot_dimension_numbers<[1], [0], [0], [1], [0, 0, 1, 1], [], []>} : vector<8x128xbf16>, vector<128x384xbf16>, vector<8x384xf32> -> vector<8x384xf32>
    %166 = vector.broadcast %8 : vector<1x384xf32> to vector<8x384xf32>
    %167 = arith.addf %165, %166 : vector<8x384xf32>
    %c8_i32_43 = arith.constant 8 : i32
    %168 = arith.muli %c4_i32, %c8_i32_43 : i32
    %169 = tpu.assume_multiple %168, 8 : i32
    %c7_i32_44 = arith.constant 7 : i32
    %170 = arith.subi %c7_i32_44, %c4_i32 : i32
    %c8_i32_45 = arith.constant 8 : i32
    %171 = arith.muli %170, %c8_i32_45 : i32
    %172 = tpu.assume_multiple %171, 8 : i32
    %173 = arith.index_cast %169 : i32 to index
    %c0_46 = arith.constant 0 : index
    %174 = vector.load %arg8[%173, %c0_46] : memref<64x384xf32, #tpu.memory_space<vmem>>, vector<8x384xf32>
    %175 = arith.index_cast %172 : i32 to index
    %c0_47 = arith.constant 0 : index
    %176 = vector.load %arg8[%175, %c0_47] : memref<64x384xf32, #tpu.memory_space<vmem>>, vector<8x384xf32>
    %177 = vector.shape_cast %13 : vector<1x384xi1> to vector<1x384xi1>
    %178 = vector.broadcast %177 : vector<1x384xi1> to vector<8x384xi1>
    %179 = arith.select %178, %174, %176 : vector<8x384xi1>, vector<8x384xf32>
    %180 = vector.extract_strided_slice %179 {offsets = [0, 0], sizes = [8, 256], strides = [1, 1]} : vector<8x384xf32> to vector<8x256xf32>
    %181 = vector.extract_strided_slice %167 {offsets = [0, 0], sizes = [8, 256], strides = [1, 1]} : vector<8x384xf32> to vector<8x256xf32>
    %182 = arith.addf %180, %181 : vector<8x256xf32>
    %183 = arith.negf %182 : vector<8x256xf32>
    %184 = math.exp %183 : vector<8x256xf32>
    %cst_48 = arith.constant 1.000000e+00 : f32
    %185 = vector.broadcast %cst_48 : f32 to vector<8x256xf32>
    %186 = arith.addf %185, %184 : vector<8x256xf32>
    %187 = arith.divf %185, %186 : vector<8x256xf32>
    %188 = vector.extract_strided_slice %187 {offsets = [0, 0], sizes = [8, 128], strides = [1, 1]} : vector<8x256xf32> to vector<8x128xf32>
    %189 = vector.extract_strided_slice %187 {offsets = [0, 128], sizes = [8, 128], strides = [1, 1]} : vector<8x256xf32> to vector<8x128xf32>
    %190 = vector.extract_strided_slice %179 {offsets = [0, 256], sizes = [8, 128], strides = [1, 1]} : vector<8x384xf32> to vector<8x128xf32>
    %191 = vector.extract_strided_slice %167 {offsets = [0, 256], sizes = [8, 128], strides = [1, 1]} : vector<8x384xf32> to vector<8x128xf32>
    %192 = arith.mulf %188, %191 : vector<8x128xf32>
    %193 = arith.addf %190, %192 : vector<8x128xf32>
    %194 = math.tanh %193 : vector<8x128xf32>
    %cst_49 = arith.constant 1.000000e+00 : f32
    %195 = vector.broadcast %cst_49 : f32 to vector<8x128xf32>
    %196 = arith.subf %195, %189 : vector<8x128xf32>
    %197 = arith.mulf %196, %194 : vector<8x128xf32>
    %198 = arith.mulf %189, %163 : vector<8x128xf32>
    %199 = arith.addf %197, %198 : vector<8x128xf32>
    %c5_i32 = arith.constant 5 : i32
    %200 = arith.truncf %199 : vector<8x128xf32> to vector<8x128xbf16>
    %cst_50 = arith.constant dense<0.000000e+00> : vector<8x384xf32>
    %201 = tpu.matmul %200, %7, %cst_50 {dimension_numbers = #tpu.dot_dimension_numbers<[1], [0], [0], [1], [0, 0, 1, 1], [], []>} : vector<8x128xbf16>, vector<128x384xbf16>, vector<8x384xf32> -> vector<8x384xf32>
    %202 = vector.broadcast %8 : vector<1x384xf32> to vector<8x384xf32>
    %203 = arith.addf %201, %202 : vector<8x384xf32>
    %c8_i32_51 = arith.constant 8 : i32
    %204 = arith.muli %c5_i32, %c8_i32_51 : i32
    %205 = tpu.assume_multiple %204, 8 : i32
    %c7_i32_52 = arith.constant 7 : i32
    %206 = arith.subi %c7_i32_52, %c5_i32 : i32
    %c8_i32_53 = arith.constant 8 : i32
    %207 = arith.muli %206, %c8_i32_53 : i32
    %208 = tpu.assume_multiple %207, 8 : i32
    %209 = arith.index_cast %205 : i32 to index
    %c0_54 = arith.constant 0 : index
    %210 = vector.load %arg8[%209, %c0_54] : memref<64x384xf32, #tpu.memory_space<vmem>>, vector<8x384xf32>
    %211 = arith.index_cast %208 : i32 to index
    %c0_55 = arith.constant 0 : index
    %212 = vector.load %arg8[%211, %c0_55] : memref<64x384xf32, #tpu.memory_space<vmem>>, vector<8x384xf32>
    %213 = vector.shape_cast %13 : vector<1x384xi1> to vector<1x384xi1>
    %214 = vector.broadcast %213 : vector<1x384xi1> to vector<8x384xi1>
    %215 = arith.select %214, %210, %212 : vector<8x384xi1>, vector<8x384xf32>
    %216 = vector.extract_strided_slice %215 {offsets = [0, 0], sizes = [8, 256], strides = [1, 1]} : vector<8x384xf32> to vector<8x256xf32>
    %217 = vector.extract_strided_slice %203 {offsets = [0, 0], sizes = [8, 256], strides = [1, 1]} : vector<8x384xf32> to vector<8x256xf32>
    %218 = arith.addf %216, %217 : vector<8x256xf32>
    %219 = arith.negf %218 : vector<8x256xf32>
    %220 = math.exp %219 : vector<8x256xf32>
    %cst_56 = arith.constant 1.000000e+00 : f32
    %221 = vector.broadcast %cst_56 : f32 to vector<8x256xf32>
    %222 = arith.addf %221, %220 : vector<8x256xf32>
    %223 = arith.divf %221, %222 : vector<8x256xf32>
    %224 = vector.extract_strided_slice %223 {offsets = [0, 0], sizes = [8, 128], strides = [1, 1]} : vector<8x256xf32> to vector<8x128xf32>
    %225 = vector.extract_strided_slice %223 {offsets = [0, 128], sizes = [8, 128], strides = [1, 1]} : vector<8x256xf32> to vector<8x128xf32>
    %226 = vector.extract_strided_slice %215 {offsets = [0, 256], sizes = [8, 128], strides = [1, 1]} : vector<8x384xf32> to vector<8x128xf32>
    %227 = vector.extract_strided_slice %203 {offsets = [0, 256], sizes = [8, 128], strides = [1, 1]} : vector<8x384xf32> to vector<8x128xf32>
    %228 = arith.mulf %224, %227 : vector<8x128xf32>
    %229 = arith.addf %226, %228 : vector<8x128xf32>
    %230 = math.tanh %229 : vector<8x128xf32>
    %cst_57 = arith.constant 1.000000e+00 : f32
    %231 = vector.broadcast %cst_57 : f32 to vector<8x128xf32>
    %232 = arith.subf %231, %225 : vector<8x128xf32>
    %233 = arith.mulf %232, %230 : vector<8x128xf32>
    %234 = arith.mulf %225, %199 : vector<8x128xf32>
    %235 = arith.addf %233, %234 : vector<8x128xf32>
    %c6_i32 = arith.constant 6 : i32
    %236 = arith.truncf %235 : vector<8x128xf32> to vector<8x128xbf16>
    %cst_58 = arith.constant dense<0.000000e+00> : vector<8x384xf32>
    %237 = tpu.matmul %236, %7, %cst_58 {dimension_numbers = #tpu.dot_dimension_numbers<[1], [0], [0], [1], [0, 0, 1, 1], [], []>} : vector<8x128xbf16>, vector<128x384xbf16>, vector<8x384xf32> -> vector<8x384xf32>
    %238 = vector.broadcast %8 : vector<1x384xf32> to vector<8x384xf32>
    %239 = arith.addf %237, %238 : vector<8x384xf32>
    %c8_i32_59 = arith.constant 8 : i32
    %240 = arith.muli %c6_i32, %c8_i32_59 : i32
    %241 = tpu.assume_multiple %240, 8 : i32
    %c7_i32_60 = arith.constant 7 : i32
    %242 = arith.subi %c7_i32_60, %c6_i32 : i32
    %c8_i32_61 = arith.constant 8 : i32
    %243 = arith.muli %242, %c8_i32_61 : i32
    %244 = tpu.assume_multiple %243, 8 : i32
    %245 = arith.index_cast %241 : i32 to index
    %c0_62 = arith.constant 0 : index
    %246 = vector.load %arg8[%245, %c0_62] : memref<64x384xf32, #tpu.memory_space<vmem>>, vector<8x384xf32>
    %247 = arith.index_cast %244 : i32 to index
    %c0_63 = arith.constant 0 : index
    %248 = vector.load %arg8[%247, %c0_63] : memref<64x384xf32, #tpu.memory_space<vmem>>, vector<8x384xf32>
    %249 = vector.shape_cast %13 : vector<1x384xi1> to vector<1x384xi1>
    %250 = vector.broadcast %249 : vector<1x384xi1> to vector<8x384xi1>
    %251 = arith.select %250, %246, %248 : vector<8x384xi1>, vector<8x384xf32>
    %252 = vector.extract_strided_slice %251 {offsets = [0, 0], sizes = [8, 256], strides = [1, 1]} : vector<8x384xf32> to vector<8x256xf32>
    %253 = vector.extract_strided_slice %239 {offsets = [0, 0], sizes = [8, 256], strides = [1, 1]} : vector<8x384xf32> to vector<8x256xf32>
    %254 = arith.addf %252, %253 : vector<8x256xf32>
    %255 = arith.negf %254 : vector<8x256xf32>
    %256 = math.exp %255 : vector<8x256xf32>
    %cst_64 = arith.constant 1.000000e+00 : f32
    %257 = vector.broadcast %cst_64 : f32 to vector<8x256xf32>
    %258 = arith.addf %257, %256 : vector<8x256xf32>
    %259 = arith.divf %257, %258 : vector<8x256xf32>
    %260 = vector.extract_strided_slice %259 {offsets = [0, 0], sizes = [8, 128], strides = [1, 1]} : vector<8x256xf32> to vector<8x128xf32>
    %261 = vector.extract_strided_slice %259 {offsets = [0, 128], sizes = [8, 128], strides = [1, 1]} : vector<8x256xf32> to vector<8x128xf32>
    %262 = vector.extract_strided_slice %251 {offsets = [0, 256], sizes = [8, 128], strides = [1, 1]} : vector<8x384xf32> to vector<8x128xf32>
    %263 = vector.extract_strided_slice %239 {offsets = [0, 256], sizes = [8, 128], strides = [1, 1]} : vector<8x384xf32> to vector<8x128xf32>
    %264 = arith.mulf %260, %263 : vector<8x128xf32>
    %265 = arith.addf %262, %264 : vector<8x128xf32>
    %266 = math.tanh %265 : vector<8x128xf32>
    %cst_65 = arith.constant 1.000000e+00 : f32
    %267 = vector.broadcast %cst_65 : f32 to vector<8x128xf32>
    %268 = arith.subf %267, %261 : vector<8x128xf32>
    %269 = arith.mulf %268, %266 : vector<8x128xf32>
    %270 = arith.mulf %261, %235 : vector<8x128xf32>
    %271 = arith.addf %269, %270 : vector<8x128xf32>
    %c7_i32_66 = arith.constant 7 : i32
    %272 = arith.truncf %271 : vector<8x128xf32> to vector<8x128xbf16>
    %cst_67 = arith.constant dense<0.000000e+00> : vector<8x384xf32>
    %273 = tpu.matmul %272, %7, %cst_67 {dimension_numbers = #tpu.dot_dimension_numbers<[1], [0], [0], [1], [0, 0, 1, 1], [], []>} : vector<8x128xbf16>, vector<128x384xbf16>, vector<8x384xf32> -> vector<8x384xf32>
    %274 = vector.broadcast %8 : vector<1x384xf32> to vector<8x384xf32>
    %275 = arith.addf %273, %274 : vector<8x384xf32>
    %c8_i32_68 = arith.constant 8 : i32
    %276 = arith.muli %c7_i32_66, %c8_i32_68 : i32
    %277 = tpu.assume_multiple %276, 8 : i32
    %c7_i32_69 = arith.constant 7 : i32
    %278 = arith.subi %c7_i32_69, %c7_i32_66 : i32
    %c8_i32_70 = arith.constant 8 : i32
    %279 = arith.muli %278, %c8_i32_70 : i32
    %280 = tpu.assume_multiple %279, 8 : i32
    %281 = arith.index_cast %277 : i32 to index
    %c0_71 = arith.constant 0 : index
    %282 = vector.load %arg8[%281, %c0_71] : memref<64x384xf32, #tpu.memory_space<vmem>>, vector<8x384xf32>
    %283 = arith.index_cast %280 : i32 to index
    %c0_72 = arith.constant 0 : index
    %284 = vector.load %arg8[%283, %c0_72] : memref<64x384xf32, #tpu.memory_space<vmem>>, vector<8x384xf32>
    %285 = vector.shape_cast %13 : vector<1x384xi1> to vector<1x384xi1>
    %286 = vector.broadcast %285 : vector<1x384xi1> to vector<8x384xi1>
    %287 = arith.select %286, %282, %284 : vector<8x384xi1>, vector<8x384xf32>
    %288 = vector.extract_strided_slice %287 {offsets = [0, 0], sizes = [8, 256], strides = [1, 1]} : vector<8x384xf32> to vector<8x256xf32>
    %289 = vector.extract_strided_slice %275 {offsets = [0, 0], sizes = [8, 256], strides = [1, 1]} : vector<8x384xf32> to vector<8x256xf32>
    %290 = arith.addf %288, %289 : vector<8x256xf32>
    %291 = arith.negf %290 : vector<8x256xf32>
    %292 = math.exp %291 : vector<8x256xf32>
    %cst_73 = arith.constant 1.000000e+00 : f32
    %293 = vector.broadcast %cst_73 : f32 to vector<8x256xf32>
    %294 = arith.addf %293, %292 : vector<8x256xf32>
    %295 = arith.divf %293, %294 : vector<8x256xf32>
    %296 = vector.extract_strided_slice %295 {offsets = [0, 0], sizes = [8, 128], strides = [1, 1]} : vector<8x256xf32> to vector<8x128xf32>
    %297 = vector.extract_strided_slice %295 {offsets = [0, 128], sizes = [8, 128], strides = [1, 1]} : vector<8x256xf32> to vector<8x128xf32>
    %298 = vector.extract_strided_slice %287 {offsets = [0, 256], sizes = [8, 128], strides = [1, 1]} : vector<8x384xf32> to vector<8x128xf32>
    %299 = vector.extract_strided_slice %275 {offsets = [0, 256], sizes = [8, 128], strides = [1, 1]} : vector<8x384xf32> to vector<8x128xf32>
    %300 = arith.mulf %296, %299 : vector<8x128xf32>
    %301 = arith.addf %298, %300 : vector<8x128xf32>
    %302 = math.tanh %301 : vector<8x128xf32>
    %cst_74 = arith.constant 1.000000e+00 : f32
    %303 = vector.broadcast %cst_74 : f32 to vector<8x128xf32>
    %304 = arith.subf %303, %297 : vector<8x128xf32>
    %305 = arith.mulf %304, %302 : vector<8x128xf32>
    %306 = arith.mulf %297, %271 : vector<8x128xf32>
    %307 = arith.addf %305, %306 : vector<8x128xf32>
    %c8_i32_75 = arith.constant 8 : i32
    %cst_76 = arith.constant dense<0.000000e+00> : vector<8xf32>
    %308 = vector.multi_reduction <add>, %307, %cst_76 [1] : vector<8x128xf32> to vector<8xf32>
    %309 = vector.shape_cast %308 : vector<8xf32> to vector<8x1xf32>
    %cst_77 = arith.constant 3.125000e-02 : f32
    %310 = vector.broadcast %cst_77 : f32 to vector<8x1xf32>
    %311 = arith.mulf %309, %310 : vector<8x1xf32>
    %312 = vector.broadcast %311 : vector<8x1xf32> to vector<8x128xf32>
    %313 = arith.subf %307, %312 : vector<8x128xf32>
    %314 = vector.broadcast %18 : vector<1x128xf32> to vector<8x128xf32>
    %315 = arith.mulf %313, %314 : vector<8x128xf32>
    %316 = arith.mulf %315, %315 : vector<8x128xf32>
    %cst_78 = arith.constant dense<0.000000e+00> : vector<8xf32>
    %317 = vector.multi_reduction <add>, %316, %cst_78 [1] : vector<8x128xf32> to vector<8xf32>
    %318 = vector.shape_cast %317 : vector<8xf32> to vector<8x1xf32>
    %cst_79 = arith.constant 3.125000e-02 : f32
    %319 = vector.broadcast %cst_79 : f32 to vector<8x1xf32>
    %320 = arith.mulf %318, %319 : vector<8x1xf32>
    %cst_80 = arith.constant 9.99999974E-6 : f32
    %321 = vector.broadcast %cst_80 : f32 to vector<8x1xf32>
    %322 = arith.addf %320, %321 : vector<8x1xf32>
    %323 = math.rsqrt %322 : vector<8x1xf32>
    %324 = vector.broadcast %323 : vector<8x1xf32> to vector<8x128xf32>
    %325 = arith.mulf %315, %324 : vector<8x128xf32>
    %c0_81 = arith.constant 0 : index
    %c0_82 = arith.constant 0 : index
    %326 = vector.load %arg5[%c0_81, %c0_82] : memref<1x128xf32, #tpu.memory_space<vmem>>, vector<1x128xf32>
    %327 = vector.broadcast %326 : vector<1x128xf32> to vector<8x128xf32>
    %328 = arith.mulf %325, %327 : vector<8x128xf32>
    %c0_83 = arith.constant 0 : index
    %c0_84 = arith.constant 0 : index
    %329 = vector.load %arg6[%c0_83, %c0_84] : memref<1x128xf32, #tpu.memory_space<vmem>>, vector<1x128xf32>
    %330 = vector.broadcast %329 : vector<1x128xf32> to vector<8x128xf32>
    %331 = arith.addf %328, %330 : vector<8x128xf32>
    %c0_85 = arith.constant 0 : index
    %c0_86 = arith.constant 0 : index
    %332 = vector.load %arg7[%c0_85, %c0_86] : memref<8x128xf32, #tpu.memory_space<vmem>>, vector<8x128xf32>
    tpu.vector_store %arg7[%c0_85, %c0_86], %331 {strides = array<i32>} : memref<8x128xf32, #tpu.memory_space<vmem>>, vector<8x128xf32>,
    return
  }
}

</mosaic_0001>

<bundles_post_ra>
// kernel: time_series_encoder.1
= control target key start
LH: loop header
LB: loop body
LE: loop exit
PB: predicated region body
PF: predicated region fallthrough
CT: control target
= control target key end

     0   :  { %12 = vsyncpa [#allocation4], 0  ;;  %s1895_s24 = smov [#allocation3]   ;;  %s2669_s0 = inlined_call_operand.vmem [shape: bf16[64,8], index: 0, kind: input, shape index: {}]   ;;  %s2670_s1 = inlined_call_operand.vmem [shape: bf16[8,384], index: 1, kind: input, shape index: {}]   ;;  %s2671_s2 = inlined_call_operand.vmem [shape: f32[1,384], index: 2, kind: input, shape index: {}]   ;;  %s2672_s3 = inlined_call_operand.hbm [shape: bf16[128,384], index: 3, kind: input, shape index: {}]   ;;  %s2673_s4 = inlined_call_operand.vmem [shape: f32[1,384], index: 4, kind: input, shape index: {}]   ;;  %s2674_s5 = inlined_call_operand.vmem [shape: f32[1,128], index: 5, kind: input, shape index: {}]   ;;  %s2675_s6 = inlined_call_operand.vmem [shape: f32[1,128], index: 6, kind: input, shape index: {}]   ;;  %s2676_s7 = inlined_call_operand.vmem [shape: f32[8,128], index: 7, kind: output, shape index: {}]  }
   0x1   :  { %s24_s25 = sshll.u32 %s1895_s24, 4  ;;  %s1871_s28 = scalar_lea.hbm %s2672_s3, 3072  ;;  %s25_s25 = int_to_ptr.vmem [resolvable:$true] %s24_s25 }
   0x2   :  { %p1872_p0 = scmp.ne.s32.totalorder %s2672_s3, %s1871_s28  ;;  %p1875_p1 = scmp.lt.u32.totalorder %s1871_s28, %s2672_s3 }
   0x4   :  { %p1877_p2 = pnand %p1875_p1, %p1872_p0 }
   0x6   :  { %1880 = shalt.err (!%p1877_p2)
}
   0x7   :  { %s1881_s10 = scalar_lea.vmem %s25_s25, 3072  ;;  %p1886_p4 = scmp.lt.s32.totalorder %s25_s25, %s25_s25 }
   0x8   :  { %p1882_p3 = scmp.ne.s32.totalorder %s25_s25, %s1881_s10  ;;  %p1887_p5 = scmp.lt.s32.totalorder %s1881_s10, %s1881_s10 }
   0xa   :  { %p1888_p6 = por %p1887_p5, %p1886_p4 }
   0xc   :  { %p1889_p7 = pnand %p1888_p6, %p1882_p3 }
   0xe   :  { %1892 = shalt.err (!%p1889_p7)
}
   0xf   :  { %s1896_s11 = smov 192   ;;  %s1897_s12 = smov 12  }
  0x10   :  { %30 = dma.hbm_to_vmem [thread:$0]  %s2672_s3, 3072, %s25_s25, [#allocation4], %s1896_s11, %s1896_s11, %s1897_s12  }
  0x11   :  { %1893 = dma.done.wait [#allocation4], 3072  }
  0x12   :  { %1894 = vsyncadd [#allocation4], 4294964224  ;;  %v2677_v0 = vmov 0   ;;  %v49_v1 = vld [vmem:[%s2670_s1] sm:$0xff]  ;;  %vm109_vm0 = vcmask 1043456   ;;  %vm96_vm1 = vcmask 64512   ;;  %v53_v36 = vlaneseq }
  0x13   :  { %151 = vmatprep.mubr.bf16.mxu0 %v2677_v0  ;;  %v1418_v2 = vcombine.high %v49_v1, %v49_v1  ;;  %v1417_v3 = vcombine.low %v49_v1, %v49_v1  ;;  %v1728_v4 = vld [vmem:[%s2669_s0] sm:$0xff]   ;;  %v1968_v8 = vld [vmem:[#allocation3 + $0x1c] ss:$12 sps:$4 sm:$0xff]   ;;  %v1989_v15 = vld [vmem:[#allocation3 + $0x4c] ss:$12 sps:$4 sm:$0xff]   ;;  %v2679_v16 = vmov 0.0  }
  0x14   :  { %v1960_v5 = vld [vmem:[#allocation3 + $0x4] ss:$12 sps:$4 sm:$0xff]   ;;  %1551 = vmatprep.mubr.msk.bf16.mxu1 %vm96_vm1, %v1728_v4  ;;  %v1965_v7 = vld [vmem:[#allocation3] ss:$12 sps:$4 sm:$0xff]   ;;  %v1742_v10 = vld [vmem:[%s2670_s1 + $0x8] ss:$0 sps:$4 sm:$0xff]  }
  0x15   :  { %1420 = vmatprep.subr.msk.bf16.mxu0 %vm109_vm0, %v1418_v2  ;;  %v111_v6 = vsel %vm109_vm0, %v1417_v3, 0  ;;  %v1971_v9 = vld [vmem:[#allocation3 + $0x18] ss:$12 sps:$4 sm:$0xff]   ;;  %v1979_v11 = vld [vmem:[#allocation3 + $0x34] ss:$12 sps:$4 sm:$0xff]   ;;  %1719 = vmatprep.subr.msk.bf16.mxu1 %vm109_vm0, %v1742_v10  ;;  %v117_v12 = vsel %vm109_vm0, %v1742_v10, 0 }
  0x16   :  { %120 = vmatpush1.bf16.msra.mxu0 %v111_v6  ;;  %v1735_v13 = vld [vmem:[%s2669_s0 + $0x8] sm:$0xff]   ;;  %v1986_v14 = vld [vmem:[#allocation3 + $0x30] ss:$12 sps:$4 sm:$0xff]   ;;  %1550 = vmatpush3.bf16.msra.mxu1 %v117_v12  ;;  %v2022_v25 = vld [vmem:[#allocation3 + $0x38] ss:$12 sps:$4 sm:$0xff]   ;;  %vm1900_vm2 = vmmov 0  }
  0x17   :  { %471 = vmatprep.subr.bf16.mxu0 %v1960_v5  ;;  %1559 = vmatprep.subr.bf16.mxu1 %v2679_v16  ;;  %v1743_v17 = vld [vmem:[%s2669_s0 + $0x10] sm:$0xff]   ;;  %v2009_v21 = vld [vmem:[#allocation3 + $0x20] ss:$12 sps:$4 sm:$0xff]   ;;  %v2014_v23 = vld [vmem:[#allocation3 + $0x7c] ss:$12 sps:$4 sm:$0xff]   ;;  %v2109_v37 = vshrl.u32 %v53_v36, 7 }
  0x18   :  { %v1999_v18 = vld [vmem:[#allocation3 + $0x8] ss:$12 sps:$4 sm:$0xff]   ;;  %v2005_v20 = vld [vmem:[#allocation3 + $0x64] ss:$12 sps:$4 sm:$0xff]   ;;  %v2011_v22 = vld [vmem:[#allocation3 + $0x60] ss:$12 sps:$4 sm:$0xff]  }
  0x19   :  { %1421 = vmatmul.mubr.msk.bf16.vlgmr.msra.gmra.mrb[0].mxu0 %vm96_vm1, %v1728_v4  ;;  %1552 = vmatmul.mubr.msk.bf16.vlgmr.msra.gmra.mrb[0].mxu1 %vm96_vm1, %v1735_v13  ;;  %v2002_v19 = vld [vmem:[#allocation3 + $0x48] ss:$12 sps:$4 sm:$0xff]   ;;  %v1750_v24 = vld [vmem:[%s2669_s0 + $0x18] sm:$0xff]   ;;  %v2057_v33 = vld [vmem:[#allocation3 + $0x80] ss:$12 sps:$4 sm:$0xff]   ;;  %v55_v38 = vsub.s32 0, %v2109_v37 }
  0x1a   :  { %472 = vmatpush1.bf16.msra.mxu0 %v1965_v7  ;;  %161 = vmatprep.mubr.bf16.mxu0 %v2677_v0  ;;  %v2030_v26 = vld [vmem:[#allocation3 + $0x78] ss:$12 sps:$4 sm:$0xff]   ;;  %v2034_v27 = vld [vmem:[#allocation3 + $0x94] ss:$12 sps:$4 sm:$0xff]   ;;  %v2037_v28 = vld [vmem:[#allocation3 + $0x50] ss:$12 sps:$4 sm:$0xff]  }
  0x1b   :  { %473 = vmatprep.subr.bf16.mxu0 %v1968_v8  ;;  %1555 = vmatprep.mubr.msk.bf16.mxu1 %vm96_vm1, %v1743_v17  ;;  %v2041_v29 = vld [vmem:[#allocation3 + $0x90] ss:$12 sps:$4 sm:$0xff]   ;;  %v2044_v30 = vld [vmem:[#allocation3 + $0xac] ss:$12 sps:$4 sm:$0xff]   ;;  %v2047_v31 = vld [vmem:[#allocation3 + $0x68] ss:$12 sps:$4 sm:$0xff]  }
  0x1c   :  { %1560 = vmatpush3.bf16.msra.mxu1 %v1999_v18  ;;  %v2052_v32 = vld [vmem:[#allocation3 + $0xa8] ss:$12 sps:$4 sm:$0xff]   ;;  %v2062_v34 = vld [vmem:[#allocation3 + $0x98] ss:$12 sps:$4 sm:$0xff]   ;;  %v2070_v35 = vld [vmem:[#allocation3 + $0xb0] ss:$12 sps:$4 sm:$0xff]  }
  0x1d   :  { %1561 = vmatprep.subr.bf16.mxu1 %v2679_v16  ;;  %v51_v39 = vld [vmem:[%s2671_s2] sm:$0x7]  ;;  %v59_v40 = vsub.s32 1, %v2109_v37  ;;  %v2681_v42 = vsub.s32 2, %v2109_v37  ;;  %v2137_v51 = vand.u32 127, %v53_v36 }
  0x1e   :  { %474 = vmatpush1.bf16.msra.mxu0 %v1971_v9  ;;  %v2121_v43 = vrot.slane %v51_v39, %v55_v38 }
  0x1f   :  { %475 = vmatprep.subr.bf16.mxu0 %v1979_v11  ;;  %v2127_v45 = vrot.slane %v51_v39, %v59_v40  ;;  %v64_v50 = vrot.slane %v51_v39, %v2681_v42  ;;  %2690 = vst [vmem:[#allocation6_spill] sm:$0xff] %v2137_v51  ;;  %v317_v53 = vadd.s32 256, %v2137_v51  ;;  %v316_v60 = vadd.s32 128, %v2137_v51 }
  0x20   :  { %1562 = vmatpush3.bf16.msra.mxu1 %v2009_v21  ;;  %vm321_vm4 = vcmp.lt.s32.totalorder %v2137_v51, 16 }
  0x21   :  { %1422 = vmatmul.mubr.msk.bf16.gmra.mrb[4].mxu0 %vm96_vm1, %v1735_v13  ;;  %1556 = vmatmul.mubr.msk.bf16.gmra.mrb[4].mxu1 %vm96_vm1, %v1750_v24  ;;  %v320_v6 = vand.u32 127, %v317_v53  ;;  %v319_v12 = vand.u32 127, %v316_v60 }
  0x22   :  { %476 = vmatpush1.bf16.msra.mxu0 %v1986_v14  ;;  %171 = vmatprep.mubr.bf16.mxu0 %v2677_v0 }
  0x23   :  { %477 = vmatprep.subr.bf16.mxu0 %v1989_v15  ;;  %1563 = vmatprep.subr.bf16.mxu1 %v2679_v16  ;;  %vm2155_vm3 = vcmp.lt.s32.totalorder %v320_v6, 16  ;;  %vm2167_vm5 = vcmp.lt.s32.totalorder %v319_v12, 16 }
  0x24   :  { %1575 = vmatprep.mubr.msk.bf16.mxu1 %vm1900_vm2, %v2679_v16  ;;  %1564 = vmatpush3.bf16.msra.mxu1 %v2022_v25 }
  0x25   :  { %1565 = vmatprep.subr.bf16.mxu1 %v2679_v16 }
  0x26   :  { %478 = vmatpush1.bf16.msra.mxu0 %v2002_v19 }
  0x27   :  { %479 = vmatprep.subr.bf16.mxu0 %v2005_v20 }
  0x28   :  { %1566 = vmatpush3.bf16.msra.mxu1 %v2037_v28 }
  0x29   :  { %1423 = vmatmul.mubr.msk.bf16.gmra.mrb[8].mxu0 %vm96_vm1, %v1743_v17  ;;  %1567 = vmatprep.subr.bf16.mxu1 %v2679_v16 }
  0x2a   :  { %480 = vmatpush1.bf16.msra.mxu0 %v2011_v22  ;;  %181 = vmatprep.mubr.bf16.mxu0 %v2677_v0 }
  0x2b   :  { %481 = vmatprep.subr.bf16.mxu0 %v2014_v23 }
  0x2c   :  { %1568 = vmatpush3.bf16.msra.mxu1 %v2047_v31 }
  0x2d   :  { %1569 = vmatprep.subr.bf16.mxu1 %v2679_v16 }
  0x2e   :  { %482 = vmatpush1.bf16.msra.mxu0 %v2030_v26 }
  0x2f   :  { %483 = vmatprep.subr.bf16.mxu0 %v2034_v27 }
  0x30   :  { %1570 = vmatpush3.bf16.msra.mxu1 %v2057_v33 }
  0x31   :  { %1424 = vmatmul.mubr.msk.bf16.gmra.mrb[12].mxu0 %vm96_vm1, %v1750_v24  ;;  %1571 = vmatprep.subr.bf16.mxu1 %v2679_v16 }
  0x32   :  { %484 = vmatpush1.bf16.msra.mxu0 %v2041_v29  ;;  %503 = vmatprep.mubr.bf16.mxu0 %v2677_v0 }
  0x33   :  { %485 = vmatprep.subr.bf16.mxu0 %v2044_v30 }
  0x34   :  { %1572 = vmatpush3.bf16.msra.mxu1 %v2062_v34 }
  0x35   :  { %1573 = vmatprep.subr.bf16.mxu1 %v2679_v16 }
  0x36   :  { %486 = vmatpush1.bf16.msra.mxu0 %v2052_v32 }
  0x37   :  { %595 = vmatprep.subr.bf16.mxu0 %v1960_v5 }
  0x38   :  { %1574 = vmatpush3.bf16.msra.mxu1 %v2070_v35 }
  0x39   :  { %504 = vmatmul.mubr.bf16.vlgmr.msra.gmra.mrb[16].mxu0 %v2677_v0  ;;  %1579 = vmatprep.subr.bf16.mxu1 %v2679_v16 }
  0x3a   :  { %596 = vmatpush1.bf16.msra.mxu0 %v1965_v7  ;;  %627 = vmatprep.mubr.bf16.mxu0 %v2677_v0 }
  0x3b   :  { %597 = vmatprep.subr.bf16.mxu0 %v1968_v8  ;;  %1576 = vmatmul.mubr.bf16.vlgmr.msra.gmra.mrb[8].mxu1 %v2677_v0 }
  0x3c   :  { %1580 = vmatpush3.bf16.msra.mxu1 %v1999_v18  ;;  %1595 = vmatprep.mubr.msk.bf16.mxu1 %vm1900_vm2, %v2679_v16 }
  0x3d   :  { %1581 = vmatprep.subr.bf16.mxu1 %v2679_v16 }
  0x3e   :  { %598 = vmatpush1.bf16.msra.mxu0 %v1971_v9 }
  0x3f   :  { %599 = vmatprep.subr.bf16.mxu0 %v1979_v11 }
  0x40   :  { %1582 = vmatpush3.bf16.msra.mxu1 %v2009_v21 }
  0x41   :  { %1583 = vmatprep.subr.bf16.mxu1 %v2679_v16 }
  0x42   :  { %600 = vmatpush1.bf16.msra.mxu0 %v1986_v14 }
  0x43   :  { %601 = vmatprep.subr.bf16.mxu0 %v1989_v15 }
  0x44   :  { %1584 = vmatpush3.bf16.msra.mxu1 %v2022_v25 }
  0x45   :  { %1585 = vmatprep.subr.bf16.mxu1 %v2679_v16 }
  0x46   :  { %602 = vmatpush1.bf16.msra.mxu0 %v2002_v19 }
  0x47   :  { %603 = vmatprep.subr.bf16.mxu0 %v2005_v20 }
  0x48   :  { %1586 = vmatpush3.bf16.msra.mxu1 %v2037_v28 }
  0x49   :  { %1587 = vmatprep.subr.bf16.mxu1 %v2679_v16 }
  0x4a   :  { %604 = vmatpush1.bf16.msra.mxu0 %v2011_v22 }
  0x4b   :  { %605 = vmatprep.subr.bf16.mxu0 %v2014_v23 }
  0x4c   :  { %1588 = vmatpush3.bf16.msra.mxu1 %v2047_v31 }
  0x4d   :  { %1589 = vmatprep.subr.bf16.mxu1 %v2679_v16 }
  0x4e   :  { %606 = vmatpush1.bf16.msra.mxu0 %v2030_v26 }
  0x4f   :  { %607 = vmatprep.subr.bf16.mxu0 %v2034_v27 }
  0x50   :  { %1590 = vmatpush3.bf16.msra.mxu1 %v2057_v33 }
  0x51   :  { %1591 = vmatprep.subr.bf16.mxu1 %v2679_v16 }
  0x52   :  { %608 = vmatpush1.bf16.msra.mxu0 %v2041_v29 }
  0x53   :  { %609 = vmatprep.subr.bf16.mxu0 %v2044_v30 }
  0x54   :  { %1592 = vmatpush3.bf16.msra.mxu1 %v2062_v34 }
  0x55   :  { %1593 = vmatprep.subr.bf16.mxu1 %v2679_v16 }
  0x56   :  { %610 = vmatpush1.bf16.msra.mxu0 %v2052_v32 }
  0x57   :  { %713 = vmatprep.subr.bf16.mxu0 %v1960_v5 }
  0x58   :  { %1594 = vmatpush3.bf16.msra.mxu1 %v2070_v35 }
  0x59   :  { %1599 = vmatprep.subr.bf16.mxu1 %v2679_v16 }
  0xec   :  { %v2116_v41 = vpop.f32.mrb[0].mxu0  ;;  %v1553_v52 = vpop.f32.mrb[0].mxu1 }
  0xed   :  { %v2123_v44 = vpop.f32.mrb[1].mxu0  ;;  %v2140_v55 = vadd.f32 %v1553_v52, %v64_v50  ;;  %v226_v56 = vpop.f32.mrb[1].mxu1 }
  0xee   :  { %v157_v46 = vpop.f32.mrb[2].mxu0  ;;  %v1554_v59 = vpop.f32.mrb[2].mxu1  ;;  %v2159_v36 = vadd.f32 %v226_v56, %v64_v50 }
  0xef   :  { %v2130_v47 = vadd.f32 %v157_v46, %v2121_v43  ;;  %v159_v48 = vpop.f32.mrb[3].mxu0  ;;  %v2147_v63 = vadd.f32 %v1554_v59, %v64_v50  ;;  %v229_v1 = vpop.f32.mrb[3].mxu1 }
  0xf0   :  { %v2133_v49 = vadd.f32 %v159_v48, %v2127_v45  ;;  %v2150_v4 = vadd.f32 %v229_v1, %v64_v50  ;;  %2694 = vst [vmem:[#allocation8_spill] sm:$0xff] %v2159_v36 }
  0xf1   :  { %2691 = vst [vmem:[#allocation7_spill] sm:$0xff] %v2147_v63 }
  0xf4   :  { %v163_v54 = vpop.f32.mrb[4].mxu0  ;;  %v1557_v13 = vpop.f32.mrb[4].mxu1 }
  0xf5   :  { %v164_v57 = vadd.f32 %v163_v54, %v2121_v43  ;;  %v165_v58 = vpop.f32.mrb[5].mxu0  ;;  %v2161_v39 = vadd.f32 %v1557_v13, %v64_v50  ;;  %v242_v46 = vpop.f32.mrb[5].mxu1 }
  0xf6   :  { %v2145_v61 = vadd.f32 %v165_v58, %v2127_v45  ;;  %v167_v62 = vpop.f32.mrb[6].mxu0  ;;  %v2164_v54 = vadd.f32 %v242_v46, %v64_v50  ;;  %v1558_v53 = vpop.f32.mrb[6].mxu1 }
  0xf7   :  { %v168_v2 = vadd.f32 %v167_v62, %v2121_v43  ;;  %v169_v3 = vpop.f32.mrb[7].mxu0  ;;  %v2182_v1 = vadd.f32 %v1558_v53, %v64_v50 }
  0xf8   :  { %v2153_v10 = vadd.f32 %v169_v3, %v2127_v45  ;;  %2695 = vst [vmem:[#allocation9_spill] sm:$0xff] %v2164_v54  ;;  %v245_v3 = vpop.f32.mrb[7].mxu1 }
  0xf9   :  { %2698 = vst [vmem:[#allocation10_spill] sm:$0xff] %v2182_v1  ;;  %v2193_v46 = vadd.f32 %v245_v3, %v64_v50  ;;  %v572_v53 = vsel %vm2155_vm3, %v2159_v36, %v2182_v1  ;;  %v313_v3 = vld [vmem:[%s2673_s4] sm:$0x7] }
  0xfc   :  { %v173_v24 = vpop.f32.mrb[8].mxu0 }
  0xfd   :  { %v174_v48 = vadd.f32 %v173_v24, %v2121_v43  ;;  %v175_v52 = vpop.f32.mrb[9].mxu0 }
  0xfe   :  { %v2172_v59 = vadd.f32 %v175_v52, %v2127_v45  ;;  %v177_v56 = vpop.f32.mrb[10].mxu0 }
  0xff   :  { %v178_v6 = vadd.f32 %v177_v56, %v2121_v43  ;;  %v179_v12 = vpop.f32.mrb[11].mxu0  ;;  %v2208_v62 = vsel %vm321_vm4, %v168_v2, %v174_v48  ;;  %v2232_v13 = vsel %vm321_vm4, %v174_v48, %v168_v2 }
 0x100   :  { %v2196_v52 = vadd.f32 %v179_v12, %v2127_v45  ;;  %2699 = vst [vmem:[#allocation11_spill] sm:$0xff] %v2232_v13  ;;  %v2727_v58 = vld [vmem:[#allocation10_spill] sm:$0xff] }
 0x101   :  { %v2220_v12 = vsel %vm321_vm4, %v164_v57, %v178_v6  ;;  %v2240_v50 = vsel %vm321_vm4, %v178_v6, %v164_v57  ;;  %v154_v57 = vadd.f32 %v2116_v41, %v2121_v43 }
 0x102   :  { %2700 = vst [vmem:[#allocation12_spill] sm:$0xff] %v2240_v50 }
 0x104   :  { %v183_v60 = vpop.f32.mrb[12].mxu0 }
 0x105   :  { %v184_v24 = vadd.f32 %v183_v60, %v2121_v43  ;;  %v185_v0 = vpop.f32.mrb[13].mxu0  ;;  %v2268_v60 = vadd.f32 %v2123_v44, %v2127_v45 }
 0x106   :  { %v2248_v2 = vadd.f32 %v185_v0, %v2127_v45  ;;  %v187_v48 = vpop.f32.mrb[14].mxu0 }
 0x107   :  { %v188_v6 = vadd.f32 %v187_v48, %v2121_v43  ;;  %v189_v16 = vpop.f32.mrb[15].mxu0  ;;  %v2259_v56 = vsel %vm321_vm4, %v2130_v47, %v184_v24  ;;  %v2264_v0 = vsel %vm321_vm4, %v184_v24, %v2130_v47  ;;  %2702 = vst [vmem:[#allocation14_spill] sm:$0xff] %v2268_v60  ;;  %v2283_v47 = vrot.slane %v313_v3, %v55_v38 }
 0x108   :  { %2701 = vst [vmem:[#allocation13_spill] sm:$0xff] %v2264_v0  ;;  %v2271_v42 = vadd.f32 %v189_v16, %v2127_v45  ;;  %v2293_v45 = vrot.slane %v313_v3, %v59_v40 }
 0x109   :  { %v570_v44 = vsel %vm321_vm4, %v154_v57, %v188_v6  ;;  %v2289_v16 = vsel %vm321_vm4, %v188_v6, %v154_v57 }
 0x10a   :  { %2703 = vst [vmem:[#allocation15_spill] sm:$0xff] %v2289_v16  ;;  %v571_v24 = vsel %vm2167_vm5, %v2268_v60, %v2271_v42 }
 0x10c   :  { %v505_v48 = vpop.f32.mrb[16].mxu0 }
 0x10d   :  { %v506_v43 = vadd.f32 %v505_v48, %v2283_v47  ;;  %v507_v41 = vpop.f32.mrb[17].mxu0  ;;  %v2704_v48 = vsub.s32 2, %v2109_v37 }
 0x10e   :  { %v508_v57 = vadd.f32 %v507_v41, %v2293_v45  ;;  %v509_v6 = vpop.f32.mrb[18].mxu0  ;;  %v546_v16 = vpop.f32.mrb[8].mxu1 }
 0x10f   :  { %v573_v51 = vadd.f32 %v570_v44, %v506_v43  ;;  %v510_v40 = vpop.f32.mrb[19].mxu0  ;;  %v1577_v50 = vpop.f32.mrb[9].mxu1  ;;  %v2307_v60 = vrot.slane %v313_v3, %v2704_v48  ;;  %v2706_v3 = vmov 0  }
 0x110   :  { %v574_v36 = vadd.f32 %v571_v24, %v508_v57  ;;  %v549_v13 = vpop.f32.mrb[10].mxu1 }
 0x111   :  { %v1454_v1 = vmul.f32 -1.442695, %v573_v51  ;;  %v1578_v54 = vpop.f32.mrb[11].mxu1  ;;  %v547_v43 = vadd.f32 %v546_v16, %v2307_v60 }
 0x112   :  { %v1455_v0 = vmul.f32 -1.442695, %v574_v36 }
 0x113   :  { %1765 = vpow2.f32 %v1454_v1 }
 0x114   :  { %1767 = vpow2.f32 %v1455_v0 }
 0x11d   :  { %v1766_v63 = vpop.eup %1765 }
 0x11e   :  { %v581_v38 = vadd.f32 1.0, %v1766_v63  ;;  %v1768_v41 = vpop.eup %1767 }
 0x11f   :  { %v582_v6 = vadd.f32 1.0, %v1768_v41 }
 0x120   :  { %1769 = vrcp.f32 %v581_v38 }
 0x121   :  { %1771 = vrcp.f32 %v582_v6 }
 0x12a   :  { %v1770_v44 = vpop.eup %1769 }
 0x12b   :  { %v587_v51 = vmul.f32 %v1770_v44, %v547_v43  ;;  %v1772_v36 = vpop.eup %1771 }
 0x12c   :  { %v590_v13 = vsub.f32 1.0, %v1772_v36  ;;  %v592_v0 = vmul.f32 0.0, %v1772_v36 }
 0x12d   :  { %v588_v1 = vadd.f32 %v587_v51, %v572_v53  ;;  %v2705_v53 = vmov 0.0  }
 0x12f   :  { %1773 = vtanh.f32 %v588_v1  ;;  %v2707_v1 = vsel %vm2167_vm5, %v2133_v49, %v2248_v2 }
 0x139   :  { %v1774_v54 = vpop.eup %1773 }
 0x13a   :  { %v591_v50 = vmul.f32 %v1774_v54, %v590_v13 }
 0x13c   :  { %v2310_v63 = vadd.f32 %v592_v0, %v591_v50 }
 0x13e   :  { %v594_v37 = vpack.c.bf16 %v2310_v63, %v2310_v63 }
 0x140   :  { %628 = vmatmul.mubr.bf16.vlgmr.msra.gmra.mrb[20].mxu0 %v594_v37  ;;  %1596 = vmatmul.mubr.bf16.vlgmr.msra.gmra.mrb[12].mxu1 %v594_v37 }
 0x141   :  { %714 = vmatpush1.bf16.msra.mxu0 %v1965_v7  ;;  %1600 = vmatpush3.bf16.msra.mxu1 %v1999_v18 }
 0x142   :  { %715 = vmatprep.subr.bf16.mxu0 %v1968_v8  ;;  %1601 = vmatprep.subr.bf16.mxu1 %v2705_v53 }
 0x143   :  { %745 = vmatprep.mubr.bf16.mxu0 %v2706_v3  ;;  %1615 = vmatprep.mubr.msk.bf16.mxu1 %vm1900_vm2, %v2705_v53 }
 0x145   :  { %716 = vmatpush1.bf16.msra.mxu0 %v1971_v9  ;;  %1602 = vmatpush3.bf16.msra.mxu1 %v2009_v21 }
 0x146   :  { %717 = vmatprep.subr.bf16.mxu0 %v1979_v11  ;;  %1603 = vmatprep.subr.bf16.mxu1 %v2705_v53 }
 0x149   :  { %718 = vmatpush1.bf16.msra.mxu0 %v1986_v14  ;;  %1604 = vmatpush3.bf16.msra.mxu1 %v2022_v25 }
 0x14a   :  { %719 = vmatprep.subr.bf16.mxu0 %v1989_v15  ;;  %1605 = vmatprep.subr.bf16.mxu1 %v2705_v53 }
 0x14d   :  { %720 = vmatpush1.bf16.msra.mxu0 %v2002_v19  ;;  %1606 = vmatpush3.bf16.msra.mxu1 %v2037_v28 }
 0x14e   :  { %721 = vmatprep.subr.bf16.mxu0 %v2005_v20  ;;  %1607 = vmatprep.subr.bf16.mxu1 %v2705_v53 }
 0x151   :  { %722 = vmatpush1.bf16.msra.mxu0 %v2011_v22  ;;  %1608 = vmatpush3.bf16.msra.mxu1 %v2047_v31 }
 0x152   :  { %723 = vmatprep.subr.bf16.mxu0 %v2014_v23  ;;  %1609 = vmatprep.subr.bf16.mxu1 %v2705_v53 }
 0x155   :  { %724 = vmatpush1.bf16.msra.mxu0 %v2030_v26  ;;  %1610 = vmatpush3.bf16.msra.mxu1 %v2057_v33 }
 0x156   :  { %725 = vmatprep.subr.bf16.mxu0 %v2034_v27  ;;  %1611 = vmatprep.subr.bf16.mxu1 %v2705_v53 }
 0x159   :  { %726 = vmatpush1.bf16.msra.mxu0 %v2041_v29  ;;  %1612 = vmatpush3.bf16.msra.mxu1 %v2062_v34 }
 0x15a   :  { %727 = vmatprep.subr.bf16.mxu0 %v2044_v30  ;;  %1613 = vmatprep.subr.bf16.mxu1 %v2705_v53 }
 0x15d   :  { %728 = vmatpush1.bf16.msra.mxu0 %v2052_v32  ;;  %1614 = vmatpush3.bf16.msra.mxu1 %v2070_v35 }
 0x15e   :  { %831 = vmatprep.subr.bf16.mxu0 %v1960_v5  ;;  %1619 = vmatprep.subr.bf16.mxu1 %v2705_v53 }
 0x213   :  { %v629_v16 = vpop.f32.mrb[20].mxu0  ;;  %v670_v24 = vpop.f32.mrb[12].mxu1 }
 0x214   :  { %v630_v38 = vadd.f32 %v629_v16, %v2283_v47  ;;  %v631_v57 = vpop.f32.mrb[21].mxu0  ;;  %v1597_v40 = vpop.f32.mrb[13].mxu1 }
 0x215   :  { %v632_v48 = vadd.f32 %v631_v57, %v2293_v45  ;;  %v633_v41 = vpop.f32.mrb[22].mxu0  ;;  %v673_v6 = vpop.f32.mrb[14].mxu1  ;;  %v671_v57 = vadd.f32 %v670_v24, %v2307_v60  ;;  %v2708_v40 = vsel %vm2155_vm3, %v2150_v4, %v2161_v39 }
 0x216   :  { %v691_v43 = vadd.f32 %v2259_v56, %v630_v38  ;;  %v634_v44 = vpop.f32.mrb[23].mxu0  ;;  %v1598_v51 = vpop.f32.mrb[15].mxu1 }
 0x217   :  { %v692_v36 = vadd.f32 %v2707_v1, %v632_v48 }
 0x218   :  { %v1456_v13 = vmul.f32 -1.442695, %v691_v43 }
 0x219   :  { %v1457_v54 = vmul.f32 -1.442695, %v692_v36 }
 0x21a   :  { %1775 = vpow2.f32 %v1456_v13 }
 0x21b   :  { %1777 = vpow2.f32 %v1457_v54 }
 0x224   :  { %v1776_v50 = vpop.eup %1775 }
 0x225   :  { %v699_v0 = vadd.f32 1.0, %v1776_v50  ;;  %v1778_v37 = vpop.eup %1777 }
 0x226   :  { %v700_v16 = vadd.f32 1.0, %v1778_v37 }
 0x227   :  { %1779 = vrcp.f32 %v699_v0 }
 0x228   :  { %1781 = vrcp.f32 %v700_v16 }
 0x231   :  { %v1780_v56 = vpop.eup %1779 }
 0x232   :  { %v705_v38 = vmul.f32 %v1780_v56, %v671_v57  ;;  %v1782_v41 = vpop.eup %1781 }
 0x233   :  { %v708_v6 = vsub.f32 1.0, %v1782_v41  ;;  %v710_v51 = vmul.f32 %v1782_v41, %v2310_v63 }
 0x234   :  { %v706_v48 = vadd.f32 %v705_v38, %v2708_v40  ;;  %v2709_v40 = vsel %vm2167_vm5, %v2145_v61, %v2196_v52 }
 0x236   :  { %1783 = vtanh.f32 %v706_v48 }
 0x240   :  { %v1784_v43 = vpop.eup %1783 }
 0x241   :  { %v709_v44 = vmul.f32 %v1784_v43, %v708_v6 }
 0x243   :  { %v2364_v1 = vadd.f32 %v710_v51, %v709_v44 }
 0x245   :  { %v712_v24 = vpack.c.bf16 %v2364_v1, %v2364_v1 }
 0x247   :  { %746 = vmatmul.mubr.bf16.vlgmr.msra.gmra.mrb[24].mxu0 %v712_v24  ;;  %1616 = vmatmul.mubr.bf16.vlgmr.msra.gmra.mrb[16].mxu1 %v712_v24 }
 0x248   :  { %832 = vmatpush1.bf16.msra.mxu0 %v1965_v7  ;;  %1620 = vmatpush3.bf16.msra.mxu1 %v1999_v18 }
 0x249   :  { %833 = vmatprep.subr.bf16.mxu0 %v1968_v8  ;;  %1621 = vmatprep.subr.bf16.mxu1 %v2705_v53 }
 0x24a   :  { %863 = vmatprep.mubr.bf16.mxu0 %v2706_v3  ;;  %1635 = vmatprep.mubr.msk.bf16.mxu1 %vm1900_vm2, %v2705_v53 }
 0x24c   :  { %834 = vmatpush1.bf16.msra.mxu0 %v1971_v9  ;;  %1622 = vmatpush3.bf16.msra.mxu1 %v2009_v21 }
 0x24d   :  { %835 = vmatprep.subr.bf16.mxu0 %v1979_v11  ;;  %1623 = vmatprep.subr.bf16.mxu1 %v2705_v53 }
 0x250   :  { %836 = vmatpush1.bf16.msra.mxu0 %v1986_v14  ;;  %1624 = vmatpush3.bf16.msra.mxu1 %v2022_v25 }
 0x251   :  { %837 = vmatprep.subr.bf16.mxu0 %v1989_v15  ;;  %1625 = vmatprep.subr.bf16.mxu1 %v2705_v53 }
 0x254   :  { %838 = vmatpush1.bf16.msra.mxu0 %v2002_v19  ;;  %1626 = vmatpush3.bf16.msra.mxu1 %v2037_v28 }
 0x255   :  { %839 = vmatprep.subr.bf16.mxu0 %v2005_v20  ;;  %1627 = vmatprep.subr.bf16.mxu1 %v2705_v53 }
 0x258   :  { %840 = vmatpush1.bf16.msra.mxu0 %v2011_v22  ;;  %1628 = vmatpush3.bf16.msra.mxu1 %v2047_v31 }
 0x259   :  { %841 = vmatprep.subr.bf16.mxu0 %v2014_v23  ;;  %1629 = vmatprep.subr.bf16.mxu1 %v2705_v53 }
 0x25c   :  { %842 = vmatpush1.bf16.msra.mxu0 %v2030_v26  ;;  %1630 = vmatpush3.bf16.msra.mxu1 %v2057_v33 }
 0x25d   :  { %843 = vmatprep.subr.bf16.mxu0 %v2034_v27  ;;  %1631 = vmatprep.subr.bf16.mxu1 %v2705_v53 }
 0x260   :  { %844 = vmatpush1.bf16.msra.mxu0 %v2041_v29  ;;  %1632 = vmatpush3.bf16.msra.mxu1 %v2062_v34 }
 0x261   :  { %845 = vmatprep.subr.bf16.mxu0 %v2044_v30  ;;  %1633 = vmatprep.subr.bf16.mxu1 %v2705_v53 }
 0x264   :  { %846 = vmatpush1.bf16.msra.mxu0 %v2052_v32  ;;  %1634 = vmatpush3.bf16.msra.mxu1 %v2070_v35 }
 0x265   :  { %949 = vmatprep.subr.bf16.mxu0 %v1960_v5  ;;  %1639 = vmatprep.subr.bf16.mxu1 %v2705_v53 }
 0x31a   :  { %v747_v63 = vpop.f32.mrb[24].mxu0  ;;  %v788_v36 = vpop.f32.mrb[16].mxu1 }
 0x31b   :  { %v748_v13 = vadd.f32 %v747_v63, %v2283_v47  ;;  %v749_v54 = vpop.f32.mrb[25].mxu0  ;;  %v1617_v50 = vpop.f32.mrb[17].mxu1  ;;  %v789_v63 = vadd.f32 %v788_v36, %v2307_v60 }
 0x31c   :  { %v750_v0 = vadd.f32 %v749_v54, %v2293_v45  ;;  %v751_v37 = vpop.f32.mrb[26].mxu0  ;;  %v791_v16 = vpop.f32.mrb[18].mxu1  ;;  %v2710_v54 = vsel %vm2155_vm3, %v2140_v55, %v2193_v46 }
 0x31d   :  { %v809_v57 = vadd.f32 %v2220_v12, %v748_v13  ;;  %v752_v56 = vpop.f32.mrb[27].mxu0  ;;  %v1618_v38 = vpop.f32.mrb[19].mxu1 }
 0x31e   :  { %v810_v48 = vadd.f32 %v2709_v40, %v750_v0 }
 0x31f   :  { %v1458_v41 = vmul.f32 -1.442695, %v809_v57 }
 0x320   :  { %v1459_v6 = vmul.f32 -1.442695, %v810_v48 }
 0x321   :  { %1785 = vpow2.f32 %v1458_v41 }
 0x322   :  { %1787 = vpow2.f32 %v1459_v6 }
 0x32b   :  { %v1786_v43 = vpop.eup %1785 }
 0x32c   :  { %v817_v44 = vadd.f32 1.0, %v1786_v43  ;;  %v1788_v51 = vpop.eup %1787 }
 0x32d   :  { %v818_v24 = vadd.f32 1.0, %v1788_v51 }
 0x32e   :  { %1789 = vrcp.f32 %v817_v44 }
 0x32f   :  { %1791 = vrcp.f32 %v818_v24 }
 0x338   :  { %v1790_v12 = vpop.eup %1789 }
 0x339   :  { %v823_v13 = vmul.f32 %v1790_v12, %v789_v63  ;;  %v1792_v0 = vpop.eup %1791 }
 0x33a   :  { %v826_v37 = vsub.f32 1.0, %v1792_v0  ;;  %v828_v56 = vmul.f32 %v1792_v0, %v2364_v1 }
 0x33b   :  { %v824_v50 = vadd.f32 %v823_v13, %v2710_v54 }
 0x33d   :  { %1793 = vtanh.f32 %v824_v50 }
 0x347   :  { %v1794_v16 = vpop.eup %1793 }
 0x348   :  { %v827_v57 = vmul.f32 %v1794_v16, %v826_v37 }
 0x34a   :  { %v2418_v38 = vadd.f32 %v828_v56, %v827_v57 }
 0x34c   :  { %v830_v36 = vpack.c.bf16 %v2418_v38, %v2418_v38 }
 0x34e   :  { %864 = vmatmul.mubr.bf16.vlgmr.msra.gmra.mrb[28].mxu0 %v830_v36  ;;  %1636 = vmatmul.mubr.bf16.vlgmr.msra.gmra.mrb[20].mxu1 %v830_v36 }
 0x34f   :  { %950 = vmatpush1.bf16.msra.mxu0 %v1965_v7  ;;  %1640 = vmatpush3.bf16.msra.mxu1 %v1999_v18 }
 0x350   :  { %951 = vmatprep.subr.bf16.mxu0 %v1968_v8  ;;  %1641 = vmatprep.subr.bf16.mxu1 %v2705_v53 }
 0x351   :  { %981 = vmatprep.mubr.bf16.mxu0 %v2706_v3  ;;  %1655 = vmatprep.mubr.msk.bf16.mxu1 %vm1900_vm2, %v2705_v53 }
 0x353   :  { %952 = vmatpush1.bf16.msra.mxu0 %v1971_v9  ;;  %1642 = vmatpush3.bf16.msra.mxu1 %v2009_v21 }
 0x354   :  { %953 = vmatprep.subr.bf16.mxu0 %v1979_v11  ;;  %1643 = vmatprep.subr.bf16.mxu1 %v2705_v53 }
 0x357   :  { %954 = vmatpush1.bf16.msra.mxu0 %v1986_v14  ;;  %1644 = vmatpush3.bf16.msra.mxu1 %v2022_v25 }
 0x358   :  { %955 = vmatprep.subr.bf16.mxu0 %v1989_v15  ;;  %1645 = vmatprep.subr.bf16.mxu1 %v2705_v53 }
 0x35b   :  { %956 = vmatpush1.bf16.msra.mxu0 %v2002_v19  ;;  %1646 = vmatpush3.bf16.msra.mxu1 %v2037_v28 }
 0x35c   :  { %957 = vmatprep.subr.bf16.mxu0 %v2005_v20  ;;  %1647 = vmatprep.subr.bf16.mxu1 %v2705_v53 }
 0x35f   :  { %958 = vmatpush1.bf16.msra.mxu0 %v2011_v22  ;;  %1648 = vmatpush3.bf16.msra.mxu1 %v2047_v31 }
 0x360   :  { %959 = vmatprep.subr.bf16.mxu0 %v2014_v23  ;;  %1649 = vmatprep.subr.bf16.mxu1 %v2705_v53 }
 0x363   :  { %960 = vmatpush1.bf16.msra.mxu0 %v2030_v26  ;;  %1650 = vmatpush3.bf16.msra.mxu1 %v2057_v33 }
 0x364   :  { %961 = vmatprep.subr.bf16.mxu0 %v2034_v27  ;;  %1651 = vmatprep.subr.bf16.mxu1 %v2705_v53 }
 0x367   :  { %962 = vmatpush1.bf16.msra.mxu0 %v2041_v29  ;;  %1652 = vmatpush3.bf16.msra.mxu1 %v2062_v34 }
 0x368   :  { %963 = vmatprep.subr.bf16.mxu0 %v2044_v30  ;;  %1653 = vmatprep.subr.bf16.mxu1 %v2705_v53 }
 0x36b   :  { %964 = vmatpush1.bf16.msra.mxu0 %v2052_v32  ;;  %1654 = vmatpush3.bf16.msra.mxu1 %v2070_v35 }
 0x36c   :  { %1055 = vmatprep.subr.bf16.mxu0 %v1960_v5  ;;  %1659 = vmatprep.subr.bf16.mxu1 %v2705_v53  ;;  %v2711_v5 = vsel %vm2167_vm5, %v2153_v10, %v2172_v59 }
 0x421   :  { %v865_v1 = vpop.f32.mrb[28].mxu0  ;;  %v906_v40 = vpop.f32.mrb[20].mxu1 }
 0x422   :  { %v866_v48 = vadd.f32 %v865_v1, %v2283_v47  ;;  %v867_v41 = vpop.f32.mrb[29].mxu0  ;;  %v1637_v6 = vpop.f32.mrb[21].mxu1  ;;  %v907_v56 = vadd.f32 %v906_v40, %v2307_v60  ;;  %v2712_v1 = vld [vmem:[#allocation7_spill] sm:$0xff] }
 0x423   :  { %v868_v43 = vadd.f32 %v867_v41, %v2293_v45  ;;  %v869_v44 = vpop.f32.mrb[30].mxu0  ;;  %v909_v51 = vpop.f32.mrb[22].mxu1 }
 0x424   :  { %v927_v24 = vadd.f32 %v2208_v62, %v866_v48  ;;  %v870_v63 = vpop.f32.mrb[31].mxu0  ;;  %v1638_v12 = vpop.f32.mrb[23].mxu1  ;;  %v2713_v48 = vld [vmem:[#allocation9_spill] sm:$0xff] }
 0x425   :  { %v928_v13 = vadd.f32 %v2711_v5, %v868_v43  ;;  %v2714_v41 = vsel %vm2155_vm3, %v2712_v1, %v2713_v48 }
 0x426   :  { %v1460_v54 = vmul.f32 -1.442695, %v927_v24 }
 0x427   :  { %v1461_v50 = vmul.f32 -1.442695, %v928_v13  ;;  %v2716_v13 = vsel %vm2167_vm5, %v2172_v59, %v2153_v10  ;;  %v2717_v10 = vsel %vm2155_vm3, %v2713_v48, %v2712_v1  ;;  %v2535_v1 = vld [vmem:[#allocation3 + $0x8] ss:$12 sps:$4 sm:$0xff]  }
 0x428   :  { %1795 = vpow2.f32 %v1460_v54  ;;  %v2538_v48 = vld [vmem:[#allocation3 + $0x1c] ss:$12 sps:$4 sm:$0xff]  }
 0x429   :  { %1797 = vpow2.f32 %v1461_v50 }
 0x432   :  { %v1796_v0 = vpop.eup %1795 }
 0x433   :  { %v935_v37 = vadd.f32 1.0, %v1796_v0  ;;  %v1798_v16 = vpop.eup %1797 }
 0x434   :  { %v936_v57 = vadd.f32 1.0, %v1798_v16 }
 0x435   :  { %1799 = vrcp.f32 %v935_v37 }
 0x436   :  { %1801 = vrcp.f32 %v936_v57 }
 0x43f   :  { %v1800_v62 = vpop.eup %1799 }
 0x440   :  { %v941_v36 = vmul.f32 %v1800_v62, %v907_v56  ;;  %v1802_v43 = vpop.eup %1801 }
 0x441   :  { %v944_v44 = vsub.f32 1.0, %v1802_v43  ;;  %v946_v63 = vmul.f32 %v1802_v43, %v2418_v38 }
 0x442   :  { %v942_v6 = vadd.f32 %v941_v36, %v2714_v41 }
 0x444   :  { %1803 = vtanh.f32 %v942_v6 }
 0x44e   :  { %v1804_v51 = vpop.eup %1803 }
 0x44f   :  { %v945_v24 = vmul.f32 %v1804_v51, %v944_v44 }
 0x451   :  { %v2472_v12 = vadd.f32 %v946_v63, %v945_v24 }
 0x453   :  { %v948_v40 = vpack.c.bf16 %v2472_v12, %v2472_v12 }
 0x455   :  { %982 = vmatmul.mubr.bf16.vlgmr.msra.gmra.mrb[32].mxu0 %v948_v40  ;;  %1656 = vmatmul.mubr.bf16.vlgmr.msra.gmra.mrb[24].mxu1 %v948_v40 }
 0x456   :  { %1056 = vmatpush1.bf16.msra.mxu0 %v1965_v7  ;;  %1660 = vmatpush3.bf16.msra.mxu1 %v1999_v18  ;;  %v2509_v7 = vld [vmem:[#allocation3 + $0x4] ss:$12 sps:$4 sm:$0xff]  }
 0x457   :  { %1057 = vmatprep.subr.bf16.mxu0 %v1968_v8  ;;  %1661 = vmatprep.subr.bf16.mxu1 %v2705_v53 }
 0x458   :  { %1087 = vmatprep.mubr.bf16.mxu0 %v2706_v3  ;;  %1675 = vmatprep.mubr.msk.bf16.mxu1 %vm1900_vm2, %v2705_v53 }
 0x45a   :  { %1058 = vmatpush1.bf16.msra.mxu0 %v1971_v9  ;;  %1662 = vmatpush3.bf16.msra.mxu1 %v2009_v21 }
 0x45b   :  { %1059 = vmatprep.subr.bf16.mxu0 %v1979_v11  ;;  %1663 = vmatprep.subr.bf16.mxu1 %v2705_v53 }
 0x45e   :  { %1060 = vmatpush1.bf16.msra.mxu0 %v1986_v14  ;;  %1664 = vmatpush3.bf16.msra.mxu1 %v2022_v25 }
 0x45f   :  { %1061 = vmatprep.subr.bf16.mxu0 %v1989_v15  ;;  %1665 = vmatprep.subr.bf16.mxu1 %v2705_v53 }
 0x462   :  { %1062 = vmatpush1.bf16.msra.mxu0 %v2002_v19  ;;  %1666 = vmatpush3.bf16.msra.mxu1 %v2037_v28 }
 0x463   :  { %1063 = vmatprep.subr.bf16.mxu0 %v2005_v20  ;;  %1667 = vmatprep.subr.bf16.mxu1 %v2705_v53 }
 0x466   :  { %1064 = vmatpush1.bf16.msra.mxu0 %v2011_v22  ;;  %1668 = vmatpush3.bf16.msra.mxu1 %v2047_v31  ;;  %v2715_v22 = vld [vmem:[#allocation11_spill] sm:$0xff] }
 0x467   :  { %1065 = vmatprep.subr.bf16.mxu0 %v2014_v23  ;;  %1669 = vmatprep.subr.bf16.mxu1 %v2705_v53 }
 0x46a   :  { %1066 = vmatpush1.bf16.msra.mxu0 %v2030_v26  ;;  %1670 = vmatpush3.bf16.msra.mxu1 %v2057_v33 }
 0x46b   :  { %1067 = vmatprep.subr.bf16.mxu0 %v2034_v27  ;;  %1671 = vmatprep.subr.bf16.mxu1 %v2705_v53 }
 0x46e   :  { %1068 = vmatpush1.bf16.msra.mxu0 %v2041_v29  ;;  %1672 = vmatpush3.bf16.msra.mxu1 %v2062_v34 }
 0x46f   :  { %1069 = vmatprep.subr.bf16.mxu0 %v2044_v30  ;;  %1673 = vmatprep.subr.bf16.mxu1 %v2705_v53 }
 0x472   :  { %1070 = vmatpush1.bf16.msra.mxu0 %v2052_v32  ;;  %1674 = vmatpush3.bf16.msra.mxu1 %v2070_v35 }
 0x473   :  { %1161 = vmatprep.subr.bf16.mxu0 %v2509_v7  ;;  %1679 = vmatprep.subr.bf16.mxu1 %v2705_v53 }
 0x528   :  { %v983_v8 = vpop.f32.mrb[32].mxu0  ;;  %v1024_v9 = vpop.f32.mrb[24].mxu1 }
 0x529   :  { %v984_v11 = vadd.f32 %v983_v8, %v2283_v47  ;;  %v985_v14 = vpop.f32.mrb[33].mxu0  ;;  %v1657_v15 = vpop.f32.mrb[25].mxu1  ;;  %v1025_v62 = vadd.f32 %v1024_v9, %v2307_v60  ;;  %v2532_v8 = vld [vmem:[#allocation3] ss:$12 sps:$4 sm:$0xff]  }
 0x52a   :  { %v986_v18 = vadd.f32 %v985_v14, %v2293_v45  ;;  %v987_v19 = vpop.f32.mrb[34].mxu0  ;;  %v1027_v20 = vpop.f32.mrb[26].mxu1  ;;  %v2549_v9 = vld [vmem:[#allocation3 + $0x34] ss:$12 sps:$4 sm:$0xff]   ;;  %v2557_v14 = vld [vmem:[#allocation3 + $0x4c] ss:$12 sps:$4 sm:$0xff]  }
 0x52b   :  { %v1033_v23 = vadd.f32 %v2715_v22, %v984_v11  ;;  %v988_v38 = vpop.f32.mrb[35].mxu0  ;;  %v1658_v5 = vpop.f32.mrb[27].mxu1  ;;  %v2553_v11 = vld [vmem:[#allocation3 + $0x30] ss:$12 sps:$4 sm:$0xff]   ;;  %v2561_v15 = vld [vmem:[#allocation3 + $0x48] ss:$12 sps:$4 sm:$0xff]  }
 0x52c   :  { %v1034_v54 = vadd.f32 %v2716_v13, %v986_v18  ;;  %v2569_v18 = vld [vmem:[#allocation3 + $0x60] ss:$12 sps:$4 sm:$0xff]   ;;  %v2718_v19 = vld [vmem:[#allocation12_spill] sm:$0xff] }
 0x52d   :  { %v1462_v50 = vmul.f32 -1.442695, %v1033_v23 }
 0x52e   :  { %v1463_v0 = vmul.f32 -1.442695, %v1034_v54 }
 0x52f   :  { %1805 = vpow2.f32 %v1462_v50 }
 0x530   :  { %1807 = vpow2.f32 %v1463_v0 }
 0x539   :  { %v1806_v37 = vpop.eup %1805 }
 0x53a   :  { %v1041_v16 = vadd.f32 1.0, %v1806_v37  ;;  %v1808_v57 = vpop.eup %1807 }
 0x53b   :  { %v1042_v56 = vadd.f32 1.0, %v1808_v57 }
 0x53c   :  { %1809 = vrcp.f32 %v1041_v16 }
 0x53d   :  { %1811 = vrcp.f32 %v1042_v56 }
 0x546   :  { %v1810_v36 = vpop.eup %1809 }
 0x547   :  { %v1047_v41 = vmul.f32 %v1810_v36, %v1025_v62  ;;  %v1812_v6 = vpop.eup %1811 }
 0x548   :  { %v1050_v43 = vsub.f32 1.0, %v1812_v6  ;;  %v1052_v24 = vmul.f32 %v1812_v6, %v2472_v12  ;;  %v2545_v12 = vld [vmem:[#allocation3 + $0x18] ss:$12 sps:$4 sm:$0xff]   ;;  %v1862_v6 = vld [vmem:[#allocation3 + $0x68] ss:$12 sps:$4 sm:$0xff]  }
 0x549   :  { %v1048_v59 = vadd.f32 %v1047_v41, %v2717_v10 }
 0x54b   :  { %1813 = vtanh.f32 %v1048_v59 }
 0x555   :  { %v1814_v44 = vpop.eup %1813 }
 0x556   :  { %v1051_v51 = vmul.f32 %v1814_v44, %v1050_v43  ;;  %v1863_v43 = vld [vmem:[#allocation3 + $0x78] ss:$12 sps:$4 sm:$0xff]   ;;  %v1864_v44 = vld [vmem:[#allocation3 + $0x80] ss:$12 sps:$4 sm:$0xff]  }
 0x558   :  { %v2528_v63 = vadd.f32 %v1052_v24, %v1051_v51  ;;  %v1865_v51 = vld [vmem:[#allocation3 + $0x94] ss:$12 sps:$4 sm:$0xff]   ;;  %v1866_v24 = vld [vmem:[#allocation3 + $0x90] ss:$12 sps:$4 sm:$0xff]  }
 0x55a   :  { %v1054_v40 = vpack.c.bf16 %v2528_v63, %v2528_v63 }
 0x55c   :  { %1088 = vmatmul.mubr.bf16.vlgmr.msra.gmra.mrb[36].mxu0 %v1054_v40  ;;  %1676 = vmatmul.mubr.bf16.vlgmr.msra.gmra.mrb[28].mxu1 %v1054_v40  ;;  %v1868_v40 = vld [vmem:[#allocation3 + $0xac] ss:$12 sps:$4 sm:$0xff]  }
 0x55d   :  { %1162 = vmatpush1.bf16.msra.mxu0 %v2532_v8  ;;  %1680 = vmatpush3.bf16.msra.mxu1 %v2535_v1 }
 0x55e   :  { %1163 = vmatprep.subr.bf16.mxu0 %v2538_v48  ;;  %1681 = vmatprep.subr.bf16.mxu1 %v2705_v53 }
 0x55f   :  { %1193 = vmatprep.mubr.bf16.mxu0 %v2706_v3  ;;  %1695 = vmatprep.mubr.msk.bf16.mxu1 %vm1900_vm2, %v2705_v53 }
 0x561   :  { %1164 = vmatpush1.bf16.msra.mxu0 %v2545_v12  ;;  %1682 = vmatpush3.bf16.msra.mxu1 %v2009_v21  ;;  %v2565_v21 = vld [vmem:[#allocation3 + $0x64] ss:$12 sps:$4 sm:$0xff]  }
 0x562   :  { %1165 = vmatprep.subr.bf16.mxu0 %v2549_v9  ;;  %1683 = vmatprep.subr.bf16.mxu1 %v2705_v53 }
 0x565   :  { %1166 = vmatpush1.bf16.msra.mxu0 %v2553_v11  ;;  %1684 = vmatpush3.bf16.msra.mxu1 %v2022_v25  ;;  %v2573_v25 = vld [vmem:[#allocation3 + $0x7c] ss:$12 sps:$4 sm:$0xff]  }
 0x566   :  { %1167 = vmatprep.subr.bf16.mxu0 %v2557_v14  ;;  %1685 = vmatprep.subr.bf16.mxu1 %v2705_v53 }
 0x569   :  { %1168 = vmatpush1.bf16.msra.mxu0 %v2561_v15  ;;  %1686 = vmatpush3.bf16.msra.mxu1 %v2037_v28 }
 0x56a   :  { %1169 = vmatprep.subr.bf16.mxu0 %v2565_v21  ;;  %1687 = vmatprep.subr.bf16.mxu1 %v2705_v53 }
 0x56d   :  { %1170 = vmatpush1.bf16.msra.mxu0 %v2569_v18  ;;  %1688 = vmatpush3.bf16.msra.mxu1 %v2047_v31 }
 0x56e   :  { %1171 = vmatprep.subr.bf16.mxu0 %v2573_v25  ;;  %1689 = vmatprep.subr.bf16.mxu1 %v2705_v53 }
 0x571   :  { %1172 = vmatpush1.bf16.msra.mxu0 %v2030_v26  ;;  %1690 = vmatpush3.bf16.msra.mxu1 %v2057_v33 }
 0x572   :  { %1173 = vmatprep.subr.bf16.mxu0 %v2034_v27  ;;  %1691 = vmatprep.subr.bf16.mxu1 %v2705_v53 }
 0x575   :  { %1174 = vmatpush1.bf16.msra.mxu0 %v2041_v29  ;;  %1692 = vmatpush3.bf16.msra.mxu1 %v2062_v34 }
 0x576   :  { %1175 = vmatprep.subr.bf16.mxu0 %v2044_v30  ;;  %1693 = vmatprep.subr.bf16.mxu1 %v2705_v53 }
 0x579   :  { %1176 = vmatpush1.bf16.msra.mxu0 %v2052_v32  ;;  %1694 = vmatpush3.bf16.msra.mxu1 %v2070_v35  ;;  %v2719_v35 = vsel %vm2167_vm5, %v2196_v52, %v2145_v61  ;;  %v2720_v61 = vsel %vm2155_vm3, %v2193_v46, %v2140_v55  ;;  %v1859_v55 = vld [vmem:[#allocation3 + $0x20] ss:$12 sps:$4 sm:$0xff]   ;;  %v1860_v46 = vld [vmem:[#allocation3 + $0x38] ss:$12 sps:$4 sm:$0xff]  }
 0x57a   :  { %1267 = vmatprep.subr.bf16.mxu0 %v2509_v7  ;;  %1699 = vmatprep.subr.bf16.mxu1 %v2705_v53 }
 0x62f   :  { %v1089_v26 = vpop.f32.mrb[36].mxu0  ;;  %v1130_v27 = vpop.f32.mrb[28].mxu1 }
 0x630   :  { %v1090_v28 = vadd.f32 %v1089_v26, %v2283_v47  ;;  %v1091_v31 = vpop.f32.mrb[37].mxu0  ;;  %v1677_v29 = vpop.f32.mrb[29].mxu1  ;;  %v1131_v0 = vadd.f32 %v1130_v27, %v2307_v60 }
 0x631   :  { %v1092_v33 = vadd.f32 %v1091_v31, %v2293_v45  ;;  %v1093_v34 = vpop.f32.mrb[38].mxu0  ;;  %v1133_v30 = vpop.f32.mrb[30].mxu1  ;;  %v2722_v31 = vsel %vm2167_vm5, %v2248_v2, %v2133_v49  ;;  %v2723_v49 = vsel %vm2155_vm3, %v2161_v39, %v2150_v4 }
 0x632   :  { %v1139_v20 = vadd.f32 %v2718_v19, %v1090_v28  ;;  %v1094_v22 = vpop.f32.mrb[39].mxu0  ;;  %v1678_v32 = vpop.f32.mrb[31].mxu1 }
 0x633   :  { %v1140_v7 = vadd.f32 %v2719_v35, %v1092_v33 }
 0x634   :  { %v1464_v23 = vmul.f32 -1.442695, %v1139_v20 }
 0x635   :  { %v1465_v38 = vmul.f32 -1.442695, %v1140_v7 }
 0x636   :  { %1815 = vpow2.f32 %v1464_v23 }
 0x637   :  { %1817 = vpow2.f32 %v1465_v38 }
 0x640   :  { %v1816_v5 = vpop.eup %1815 }
 0x641   :  { %v1147_v13 = vadd.f32 1.0, %v1816_v5  ;;  %v1818_v54 = vpop.eup %1817 }
 0x642   :  { %v1148_v50 = vadd.f32 1.0, %v1818_v54 }
 0x643   :  { %1819 = vrcp.f32 %v1147_v13 }
 0x644   :  { %1821 = vrcp.f32 %v1148_v50 }
 0x64d   :  { %v1820_v37 = vpop.eup %1819 }
 0x64e   :  { %v1153_v16 = vmul.f32 %v1820_v37, %v1131_v0  ;;  %v1822_v57 = vpop.eup %1821 }
 0x64f   :  { %v1156_v56 = vsub.f32 1.0, %v1822_v57  ;;  %v1158_v41 = vmul.f32 %v1822_v57, %v2528_v63  ;;  %v1867_v63 = vld [vmem:[#allocation3 + $0x98] ss:$12 sps:$4 sm:$0xff]  }
 0x650   :  { %v1154_v52 = vadd.f32 %v1153_v16, %v2720_v61 }
 0x652   :  { %1823 = vtanh.f32 %v1154_v52 }
 0x65c   :  { %v1824_v62 = vpop.eup %1823 }
 0x65d   :  { %v1157_v36 = vmul.f32 %v1824_v62, %v1156_v56  ;;  %v2724_v62 = vld [vmem:[#allocation15_spill] sm:$0xff] }
 0x65f   :  { %v2604_v10 = vadd.f32 %v1158_v41, %v1157_v36 }
 0x661   :  { %v1160_v59 = vpack.c.bf16 %v2604_v10, %v2604_v10 }
 0x663   :  { %1194 = vmatmul.mubr.bf16.vlgmr.msra.gmra.mrb[40].mxu0 %v1160_v59  ;;  %1696 = vmatmul.mubr.bf16.vlgmr.msra.gmra.mrb[32].mxu1 %v1160_v59 }
 0x664   :  { %1268 = vmatpush1.bf16.msra.mxu0 %v2532_v8  ;;  %1700 = vmatpush3.bf16.msra.mxu1 %v2535_v1  ;;  %v1869_v8 = vld [vmem:[#allocation3 + $0xa8] ss:$12 sps:$4 sm:$0xff]   ;;  %v1870_v1 = vld [vmem:[#allocation3 + $0xb0] ss:$12 sps:$4 sm:$0xff]  }
 0x665   :  { %1269 = vmatprep.subr.bf16.mxu0 %v2538_v48  ;;  %1701 = vmatprep.subr.bf16.mxu1 %v2705_v53 }
 0x666   :  { %1299 = vmatprep.mubr.bf16.mxu0 %v2706_v3  ;;  %1715 = vmatprep.mubr.msk.bf16.mxu1 %vm1900_vm2, %v2705_v53  ;;  %v1861_v3 = vld [vmem:[#allocation3 + $0x50] ss:$12 sps:$4 sm:$0xff]  }
 0x668   :  { %1270 = vmatpush1.bf16.msra.mxu0 %v2545_v12  ;;  %1702 = vmatpush3.bf16.msra.mxu1 %v1859_v55 }
 0x669   :  { %1271 = vmatprep.subr.bf16.mxu0 %v2549_v9  ;;  %1703 = vmatprep.subr.bf16.mxu1 %v2705_v53 }
 0x66c   :  { %1272 = vmatpush1.bf16.msra.mxu0 %v2553_v11  ;;  %1704 = vmatpush3.bf16.msra.mxu1 %v1860_v46 }
 0x66d   :  { %1273 = vmatprep.subr.bf16.mxu0 %v2557_v14  ;;  %1705 = vmatprep.subr.bf16.mxu1 %v2705_v53 }
 0x670   :  { %1274 = vmatpush1.bf16.msra.mxu0 %v2561_v15  ;;  %1706 = vmatpush3.bf16.msra.mxu1 %v1861_v3 }
 0x671   :  { %1275 = vmatprep.subr.bf16.mxu0 %v2565_v21  ;;  %1707 = vmatprep.subr.bf16.mxu1 %v2705_v53 }
 0x674   :  { %1276 = vmatpush1.bf16.msra.mxu0 %v2569_v18  ;;  %1708 = vmatpush3.bf16.msra.mxu1 %v1862_v6 }
 0x675   :  { %1277 = vmatprep.subr.bf16.mxu0 %v2573_v25  ;;  %1709 = vmatprep.subr.bf16.mxu1 %v2705_v53  ;;  %v2721_v25 = vld [vmem:[#allocation13_spill] sm:$0xff] }
 0x678   :  { %1278 = vmatpush1.bf16.msra.mxu0 %v1863_v43  ;;  %1710 = vmatpush3.bf16.msra.mxu1 %v1864_v44 }
 0x679   :  { %1279 = vmatprep.subr.bf16.mxu0 %v1865_v51  ;;  %1711 = vmatprep.subr.bf16.mxu1 %v2705_v53 }
 0x67c   :  { %1280 = vmatpush1.bf16.msra.mxu0 %v1866_v24  ;;  %1712 = vmatpush3.bf16.msra.mxu1 %v1867_v63 }
 0x67d   :  { %1281 = vmatprep.subr.bf16.mxu0 %v1868_v40  ;;  %1713 = vmatprep.subr.bf16.mxu1 %v2705_v53  ;;  %v2728_v40 = vld [vmem:[#allocation8_spill] sm:$0xff] }
 0x680   :  { %1282 = vmatpush1.bf16.msra.mxu0 %v1869_v8  ;;  %1714 = vmatpush3.bf16.msra.mxu1 %v1870_v1 }
 0x736   :  { %v1195_v48 = vpop.f32.mrb[40].mxu0  ;;  %v1236_v12 = vpop.f32.mrb[32].mxu1 }
 0x737   :  { %v1196_v9 = vadd.f32 %v1195_v48, %v2283_v47  ;;  %v1197_v11 = vpop.f32.mrb[41].mxu0  ;;  %v1697_v14 = vpop.f32.mrb[33].mxu1  ;;  %v1237_v32 = vadd.f32 %v1236_v12, %v2307_v60 }
 0x738   :  { %v1198_v15 = vadd.f32 %v1197_v11, %v2293_v45  ;;  %v1199_v21 = vpop.f32.mrb[42].mxu0  ;;  %v1239_v18 = vpop.f32.mrb[34].mxu1 }
 0x739   :  { %v1245_v26 = vadd.f32 %v2721_v25, %v1196_v9  ;;  %v1200_v27 = vpop.f32.mrb[43].mxu0  ;;  %v1698_v28 = vpop.f32.mrb[35].mxu1 }
 0x73a   :  { %v1246_v29 = vadd.f32 %v2722_v31, %v1198_v15  ;;  %v2730_v15 = vld [vmem:[#allocation6_spill] sm:$0xff] }
 0x73b   :  { %v1466_v33 = vmul.f32 -1.442695, %v1245_v26  ;;  %vm324_vm6 = vcmp.lt.s32.totalorder %v2730_v15, 32 }
 0x73c   :  { %v1467_v34 = vmul.f32 -1.442695, %v1246_v29  ;;  %v1429_v18 = vsel %vm324_vm6, 1.0, %v2705_v53 }
 0x73d   :  { %1825 = vpow2.f32 %v1466_v33  ;;  %v1470_v33 = vld [vmem:[%s2674_s5] ss:$0 sm:$0xff] }
 0x73e   :  { %1827 = vpow2.f32 %v1467_v34 }
 0x747   :  { %v1826_v30 = vpop.eup %1825 }
 0x748   :  { %v1253_v19 = vadd.f32 1.0, %v1826_v30  ;;  %v1828_v20 = vpop.eup %1827  ;;  %v1471_v30 = vld [vmem:[%s2675_s6] ss:$0 sm:$0xff] }
 0x749   :  { %v1254_v22 = vadd.f32 1.0, %v1828_v20 }
 0x74a   :  { %1829 = vrcp.f32 %v1253_v19 }
 0x74b   :  { %1831 = vrcp.f32 %v1254_v22 }
 0x754   :  { %v1830_v35 = vpop.eup %1829 }
 0x755   :  { %v1259_v7 = vmul.f32 %v1830_v35, %v1237_v32  ;;  %v1832_v23 = vpop.eup %1831 }
 0x756   :  { %v1262_v38 = vsub.f32 1.0, %v1832_v23  ;;  %v1264_v54 = vmul.f32 %v1832_v23, %v2604_v10  ;;  %v2725_v10 = vld [vmem:[#allocation14_spill] sm:$0xff] }
 0x757   :  { %v1260_v2 = vadd.f32 %v1259_v7, %v2723_v49  ;;  %v2726_v55 = vsel %vm2167_vm5, %v2271_v42, %v2725_v10  ;;  %v2729_v42 = vsel %vm2155_vm3, %v2727_v58, %v2728_v40 }
 0x759   :  { %1833 = vtanh.f32 %v1260_v2 }
 0x763   :  { %v1834_v5 = vpop.eup %1833 }
 0x764   :  { %v1263_v13 = vmul.f32 %v1834_v5, %v1262_v38 }
 0x766   :  { %v1265_v50 = vadd.f32 %v1264_v54, %v1263_v13 }
 0x768   :  { %v1266_v0 = vpack.c.bf16 %v1265_v50, %v1265_v50 }
 0x76a   :  { %1300 = vmatmul.mubr.bf16.vlgmr.msra.gmra.mrb[44].mxu0 %v1266_v0  ;;  %1716 = vmatmul.mubr.bf16.vlgmr.msra.gmra.mrb[36].mxu1 %v1266_v0 }
 0x83d   :  { %v1301_v37 = vpop.f32.mrb[44].mxu0  ;;  %v1342_v16 = vpop.f32.mrb[36].mxu1 }
 0x83e   :  { %v1302_v61 = vadd.f32 %v1301_v37, %v2283_v47  ;;  %v1303_v52 = vpop.f32.mrb[45].mxu0  ;;  %v1717_v57 = vpop.f32.mrb[37].mxu1  ;;  %v1343_v51 = vadd.f32 %v1342_v16, %v2307_v60 }
 0x83f   :  { %v1304_v4 = vadd.f32 %v1303_v52, %v2293_v45  ;;  %v1305_v39 = vpop.f32.mrb[46].mxu0  ;;  %v1345_v56 = vpop.f32.mrb[38].mxu1 }
 0x840   :  { %v1351_v36 = vadd.f32 %v2724_v62, %v1302_v61  ;;  %v1306_v41 = vpop.f32.mrb[47].mxu0  ;;  %v1718_v59 = vpop.f32.mrb[39].mxu1 }
 0x841   :  { %v1352_v46 = vadd.f32 %v2726_v55, %v1304_v4 }
 0x842   :  { %v1468_v3 = vmul.f32 -1.442695, %v1351_v36 }
 0x843   :  { %v1469_v6 = vmul.f32 -1.442695, %v1352_v46 }
 0x844   :  { %1835 = vpow2.f32 %v1468_v3 }
 0x845   :  { %1837 = vpow2.f32 %v1469_v6 }
 0x84e   :  { %v1836_v47 = vpop.eup %1835 }
 0x84f   :  { %v1359_v43 = vadd.f32 1.0, %v1836_v47  ;;  %v1838_v45 = vpop.eup %1837 }
 0x850   :  { %v1360_v44 = vadd.f32 1.0, %v1838_v45 }
 0x851   :  { %1839 = vrcp.f32 %v1359_v43 }
 0x852   :  { %1841 = vrcp.f32 %v1360_v44 }
 0x85b   :  { %v1840_v24 = vpop.eup %1839 }
 0x85c   :  { %v1365_v63 = vmul.f32 %v1840_v24, %v1343_v51  ;;  %v1842_v1 = vpop.eup %1841 }
 0x85d   :  { %v1368_v48 = vsub.f32 1.0, %v1842_v1  ;;  %v1370_v11 = vmul.f32 %v1842_v1, %v1265_v50 }
 0x85e   :  { %v1366_v8 = vadd.f32 %v1365_v63, %v2729_v42 }
 0x860   :  { %1843 = vtanh.f32 %v1366_v8 }
 0x86a   :  { %v1844_v12 = vpop.eup %1843 }
 0x86b   :  { %v1369_v9 = vmul.f32 %v1844_v12, %v1368_v48 }
 0x86d   :  { %v1371_v14 = vadd.f32 %v1370_v11, %v1369_v9 }
 0x86f   :  { %1372 = vadd.xlane.f32.xlu0 %v1371_v14 }
 0x8fc   :  { %v1373_v60 = vpop.xlane.xlu0 %1372 }
 0x8fd   :  { %v1374_v21 = vmul.f32 0.03125, %v1373_v60 }
 0x8ff   :  { %v1375_v25 = vsub.f32 %v1371_v14, %v1374_v21 }
 0x901   :  { %v1376_v17 = vmul.f32 %v1429_v18, %v1375_v25 }
 0x903   :  { %v1377_v26 = vmul.f32 %v1376_v17, %v1376_v17 }
 0x905   :  { %1378 = vadd.xlane.f32.xlu0 %v1377_v26 }
 0x992   :  { %v1379_v27 = vpop.xlane.xlu0 %1378 }
 0x993   :  { %v1380_v28 = vmul.f32 0.03125, %v1379_v27 }
 0x995   :  { %v1381_v31 = vadd.f32 1e-05, %v1380_v28 }
 0x997   :  { %1845 = vrsqrt.f32 %v1381_v31 }
 0x9a1   :  { %v1846_v29 = vpop.eup %1845 }
 0x9a2   :  { %v1383_v34 = vmul.f32 %v1846_v29, %v1376_v17 }
 0x9a4   :  { %v1391_v19 = vmul.f32 %v1470_v33, %v1383_v34 }
 0x9a6   :  { %v1399_v53 = vadd.f32 %v1471_v30, %v1391_v19 }
 0x9a8   :  { %1400 = vst [vmem:[%s2676_s7] sm:$0xff] %v1399_v53 }
 0x9a9   :  { %1405 = vsyncpa [#allocation4], 1 }

</bundles_post_ra>
